<compile_context>
chip_gen: v7x
topology: tpu7x:2x2x1
jax: 0.10.0
libtpu: 0.0.40
codegen_flags: <defaults>
</compile_context>

<pallas_src>
import jax
import jax.numpy as jnp
from jax.experimental import pallas as pl
from jax.experimental.pallas import tpu as pltpu

_LANE = 128


def _round_up(x, m):
    return ((x + m - 1) // m) * m


def _gather_kernel(idx_ref, w_ref, o_ref):
    """One-hot MXU gather of a block of token embeddings.

    idx_ref : VMEM (TB, 1) int32        token ids for this token block
    w_ref   : VMEM (VB, E_pad) f32      one vocab-block tile of the table
    o_ref   : VMEM (TB, E_pad) f32      gathered embeddings for this block
    """
    tb = o_ref.shape[0]
    vb = w_ref.shape[0]
    k = pl.program_id(1)

    ids = idx_ref[...]                                  # (TB, 1)
    local = ids - k * vb                                # ids local to this vocab block
    one_hot = (
        jax.lax.broadcasted_iota(jnp.int32, (tb, vb), 1) == local
    ).astype(w_ref.dtype)                               # (TB, VB)

    # Single MXU push per step; HIGHEST precision keeps the f32 rows exact.
    partial = jnp.dot(
        one_hot,
        w_ref[...],
        preferred_element_type=jnp.float32,
        precision=jax.lax.Precision.HIGHEST,
    ).astype(o_ref.dtype)

    @pl.when(k == 0)
    def _():
        o_ref[...] = partial

    @pl.when(k > 0)
    def _():
        o_ref[...] += partial


def word2vec_forward(data, ivectors, *, tokens_per_block=256, vocab_block_cap=2048):
    """data: int array of any shape; ivectors: (V+1, E). Returns data.shape + (E,)."""
    lead_shape = data.shape
    vp1, emb = ivectors.shape

    flat_idx = data.reshape(-1).astype(jnp.int32)
    n = flat_idx.shape[0]

    tb = tokens_per_block
    assert tb % 8 == 0, "tokens_per_block must be a multiple of 8 (sublanes)"
    num_tok_blocks = pl.cdiv(n, tb)
    n_pad = num_tok_blocks * tb

    # Index padding is tiny (4 B/token vs >= 512 B/token of output); padded
    # slots gather row 0 and are sliced off below, so they never alias output.
    if n_pad != n:
        flat_idx = jnp.pad(flat_idx, (0, n_pad - n))
    idx_col = flat_idx.reshape(n_pad, 1)

    # Lane-dense embedding dim and lane/sublane-aligned vocab blocks.
    e_pad = _round_up(emb, _LANE)
    vb = min(_round_up(vp1, _LANE), _round_up(vocab_block_cap, _LANE))
    v_pad = _round_up(vp1, vb)
    num_vb = v_pad // vb

    table = ivectors
    if (v_pad, e_pad) != (vp1, emb):
        table = jnp.pad(ivectors, ((0, v_pad - vp1), (0, e_pad - emb)))

    # Grid-invariant table block (single vocab block) -> no point double
    # buffering it; multiple vocab blocks -> default double buffering overlaps
    # the next table-tile DMA with the current matmul.
    table_spec_kwargs = {"pipeline_mode": pl.Buffered(1)} if num_vb == 1 else {}

    out = pl.pallas_call(
        _gather_kernel,
        out_shape=jax.ShapeDtypeStruct((n_pad, e_pad), ivectors.dtype),
        grid=(num_tok_blocks, num_vb),
        in_specs=[
            # Token ids for this block, as a (TB, 1) column (broadcasts across
            # lanes against the iota without any transpose).
            pl.BlockSpec((tb, 1), lambda i, k: (i, 0)),
            # One vocab-block tile of the (padded) table.
            pl.BlockSpec((vb, e_pad), lambda i, k: (k, 0), **table_spec_kwargs),
        ],
        # Output tile is resident across the vocab (reduction) axis.
        out_specs=pl.BlockSpec((tb, e_pad), lambda i, k: (i, 0)),
        compiler_params=pltpu.CompilerParams(
            dimension_semantics=("parallel", "arbitrary"),
        ),
    )(idx_col, table)

    return out[:n, :emb].reshape(*lead_shape, emb)


def init_word2vec_params(key, vocab_size, embedding_size):
    """Deterministic init mirroring torch.nn.init.uniform_(-.5/E, .5/E)."""
    k_i, k_o = jax.random.split(key)
    lo, hi = -0.5 / embedding_size, 0.5 / embedding_size
    ivectors = jax.random.uniform(
        k_i, (vocab_size + 1, embedding_size), jnp.float32, lo, hi
    )
    ovectors = jax.random.uniform(
        k_o, (vocab_size + 1, embedding_size), jnp.float32, lo, hi
    )
    return ivectors, ovectors


if __name__ == "__main__":
    key = jax.random.PRNGKey(0)
    vocab_size = 50
    embedding_size = 32
    B, S = 2, 8

    k_params, k_data = jax.random.split(key)
    ivectors, ovectors = init_word2vec_params(k_params, vocab_size, embedding_size)

    data = jax.random.randint(k_data, (B, S), 0, vocab_size + 1, dtype=jnp.int32)

    out = jax.block_until_ready(word2vec_forward(data, ivectors))

    # Reference check: plain-JAX gather (same semantics as nn.Embedding fwd).
    ref = jnp.take(ivectors, data, axis=0)
    assert out.shape == (B, S, embedding_size), out.shape
    assert jnp.allclose(out, ref), "mismatch vs reference gather"

    print("KERNEL_OK")
</pallas_src>

<mosaic_0001>
module attributes {stable_mosaic.version = 11 : i64} {
  func.func @_gather_kernel(%arg0: i32, %arg1: i32, %arg2: memref<256x1xi32, #tpu.memory_space<vmem>>, %arg3: memref<128x128xf32, #tpu.memory_space<vmem>>, %arg4: memref<256x128xf32, #tpu.memory_space<vmem>>) attributes {dimension_semantics = [#tpu.dimension_semantics<parallel>, #tpu.dimension_semantics<arbitrary>], iteration_bounds = array<i64: 1, 1>, scalar_prefetch = 0 : i64, scratch_operands = 0 : i64, tpu.core_type = #tpu.core_type<tc>, window_params = [{transform_indices = @transform_0, window_bounds = array<i64: 256, 1>}, {pipeline_mode = #tpu.pipeline_mode<synchronous>, transform_indices = @transform_1, window_bounds = array<i64: 128, 128>}, {transform_indices = @transform_2, window_bounds = array<i64: 256, 128>}]} {
    %c0 = arith.constant 0 : index
    %c0_0 = arith.constant 0 : index
    %0 = vector.load %arg2[%c0, %c0_0] : memref<256x1xi32, #tpu.memory_space<vmem>>, vector<256x1xi32>
    %c128_i32 = arith.constant 128 : i32
    %1 = arith.muli %arg1, %c128_i32 : i32
    %2 = vector.broadcast %1 : i32 to vector<256x1xi32>
    %3 = arith.subi %0, %2 : vector<256x1xi32>
    %4 = tpu.iota {dimensions = array<i32: 1>} : vector<256x128xi32>
    %5 = vector.broadcast %3 : vector<256x1xi32> to vector<256x128xi32>
    %6 = arith.cmpi eq, %4, %5 : vector<256x128xi32>
    %7 = arith.extui %6 : vector<256x128xi1> to vector<256x128xi32>
    %8 = arith.sitofp %7 : vector<256x128xi32> to vector<256x128xf32>
    %c0_1 = arith.constant 0 : index
    %c0_2 = arith.constant 0 : index
    %9 = vector.load %arg3[%c0_1, %c0_2] : memref<128x128xf32, #tpu.memory_space<vmem>>, vector<128x128xf32>
    %cst = arith.constant dense<0.000000e+00> : vector<256x128xf32>
    %10 = tpu.matmul %8, %9, %cst {dimension_numbers = #tpu.dot_dimension_numbers<[1], [0], [0], [1], [0, 0, 1, 1], [], []>, precision = #tpu.contract_precision<fp32>} : vector<256x128xf32>, vector<128x128xf32>, vector<256x128xf32> -> vector<256x128xf32>
    %c0_i32 = arith.constant 0 : i32
    %11 = arith.cmpi eq, %arg1, %c0_i32 : i32
    %12 = arith.extui %11 : i1 to i32
    %c0_i32_3 = arith.constant 0 : i32
    %13 = arith.cmpi ne, %12, %c0_i32_3 : i32
    scf.if %13 {
      %c0_6 = arith.constant 0 : index
      %c0_7 = arith.constant 0 : index
      %17 = vector.load %arg4[%c0_6, %c0_7] : memref<256x128xf32, #tpu.memory_space<vmem>>, vector<256x128xf32>
      tpu.vector_store %arg4[%c0_6, %c0_7], %10 {strides = array<i32>} : memref<256x128xf32, #tpu.memory_space<vmem>>, vector<256x128xf32>,
    } else {
    }
    %c0_i32_4 = arith.constant 0 : i32
    %14 = arith.cmpi sgt, %arg1, %c0_i32_4 : i32
    %15 = arith.extui %14 : i1 to i32
    %c0_i32_5 = arith.constant 0 : i32
    %16 = arith.cmpi ne, %15, %c0_i32_5 : i32
    scf.if %16 {
      %c0_6 = arith.constant 0 : index
      %c0_7 = arith.constant 0 : index
      %17 = vector.load %arg4[%c0_6, %c0_7] : memref<256x128xf32, #tpu.memory_space<vmem>>, vector<256x128xf32>
      %18 = arith.addf %17, %10 : vector<256x128xf32>
      %c0_8 = arith.constant 0 : index
      %c0_9 = arith.constant 0 : index
      %19 = vector.load %arg4[%c0_8, %c0_9] : memref<256x128xf32, #tpu.memory_space<vmem>>, vector<256x128xf32>
      tpu.vector_store %arg4[%c0_8, %c0_9], %18 {strides = array<i32>} : memref<256x128xf32, #tpu.memory_space<vmem>>, vector<256x128xf32>,
    } else {
    }
    return
  }
  func.func @transform_0(%arg0: i32, %arg1: i32) -> (i32, i32) {
    %c0_i32 = arith.constant 0 : i32
    %c0_i32_0 = arith.constant 0 : i32
    return %arg0, %c0_i32 : i32, i32
  }
  func.func @transform_1(%arg0: i32, %arg1: i32) -> (i32, i32) {
    %c0_i32 = arith.constant 0 : i32
    %c0_i32_0 = arith.constant 0 : i32
    return %arg1, %c0_i32 : i32, i32
  }
  func.func @transform_2(%arg0: i32, %arg1: i32) -> (i32, i32) {
    %c0_i32 = arith.constant 0 : i32
    %c0_i32_0 = arith.constant 0 : i32
    return %arg0, %c0_i32 : i32, i32
  }
}

</mosaic_0001>

<bundles_post_ra>
// kernel: tpu_custom_call.1
= control target key start
LH: loop header
LB: loop body
LE: loop exit
PB: predicated region body
PF: predicated region fallthrough
CT: control target
= control target key end

     0   :  { %v3694_v2 = vmov 0   ;;  %s4981_s0 = inlined_call_operand.vmem [shape: s32[256,1], index: 0, kind: input, shape index: {}]   ;;  %s4982_s1 = inlined_call_operand.vmem [shape: f32[128,128], index: 1, kind: input, shape index: {}]   ;;  %s4983_s2 = inlined_call_operand.hbm [shape: f32[256,128], index: 2, kind: output, shape index: {}]  }
   0x1   :  { %v14_v0 = vld [vmem:[%s4981_s0 + $0x10] sm:$0xff]  ;;  %v12_v1 = vld [vmem:[%s4981_s0] sm:$0xff]  ;;  %3669 = vset.pattern.permute.xlu1 %v3694_v2  ;;  %3668 = vset.pattern.permute.xlu0 %v3694_v2  ;;  %v15_v3 = vld [vmem:[%s4981_s0 + $0x18] sm:$0xff] }
   0x2   :  { %87 = vperm.xlu1 %3669, %v14_v0   ;;  %81 = vperm.xlu0 %3668, %v12_v1   ;;  %v13_v4 = vld [vmem:[%s4981_s0 + $0x8] sm:$0xff]  ;;  %v16_v6 = vld [vmem:[%s4981_s0 + $0x20] sm:$0xff]  ;;  %v19_v7 = vld [vmem:[%s4981_s0 + $0x38] sm:$0xff] }
   0x3   :  { %v17_v5 = vld [vmem:[%s4981_s0 + $0x28] sm:$0xff]  ;;  %v18_v8 = vld [vmem:[%s4981_s0 + $0x30] sm:$0xff]  ;;  %v3742_v9 = vld [vmem:[%s4982_s1] sm:$0xff] }
   0x4   :  { %v3747_v10 = vld [vmem:[%s4982_s1 + $0x8] sm:$0xff]  ;;  %v289_v11 = vand.u32 4294901760, %v3742_v9  ;;  %v274_v12 = vld [vmem:[%s4982_s1 + $0x10] sm:$0xff]  ;;  %v275_v13 = vld [vmem:[%s4982_s1 + $0x18] sm:$0xff] }
   0x5   :  { %v292_v14 = vand.u32 4294901760, %v3747_v10  ;;  %v295_v15 = vand.u32 4294901760, %v274_v12  ;;  %v298_v16 = vand.u32 4294901760, %v275_v13  ;;  %v3760_v17 = vld [vmem:[%s4982_s1 + $0x20] sm:$0xff]  ;;  %v3765_v18 = vld [vmem:[%s4982_s1 + $0x28] sm:$0xff]  ;;  %v3786_v25 = vld [vmem:[%s4982_s1 + $0x30] sm:$0xff] }
   0x6   :  { %90 = vperm.xlu1 %3669, %v15_v3   ;;  %84 = vperm.xlu0 %3668, %v13_v4   ;;  %v21_v20 = vld [vmem:[%s4981_s0 + $0x48] sm:$0xff]  ;;  %v20_v21 = vld [vmem:[%s4981_s0 + $0x40] sm:$0xff]  ;;  %v301_v23 = vand.u32 4294901760, %v3760_v17  ;;  %v304_v24 = vand.u32 4294901760, %v3765_v18  ;;  %v3791_v26 = vld [vmem:[%s4982_s1 + $0x38] sm:$0xff] }
   0x7   :  { %v3769_v19 = vpack.c.bf16 %v292_v14, %v289_v11  ;;  %v3777_v22 = vpack.c.bf16 %v298_v16, %v295_v15 }
   0x9   :  { %3407 = vmatprep.subr.bf16.mxu0 %v3769_v19  ;;  %3311 = vmatprep.subr.bf16.mxu1 %v3769_v19 }
   0xa   :  { %96 = vperm.xlu1 %3669, %v17_v5   ;;  %93 = vperm.xlu0 %3668, %v16_v6  }
   0xe   :  { %102 = vperm.xlu1 %3669, %v19_v7   ;;  %99 = vperm.xlu0 %3668, %v18_v8  }
   0xf   :  { %7 = vsyncpa [#allocation3], 0  ;;  %3409 = vmatpush3.bf16.msra.mxu0 %v3769_v19  ;;  %3313 = vmatpush3.bf16.msra.mxu1 %v3769_v19  ;;  %v23_v27 = vld [vmem:[%s4981_s0 + $0x58] sm:$0xff]  ;;  %v22_v28 = vld [vmem:[%s4981_s0 + $0x50] sm:$0xff]  ;;  %v3807_v29 = vpack.c.bf16 %v304_v24, %v301_v23  ;;  %v307_v30 = vand.u32 4294901760, %v3786_v25  ;;  %v310_v31 = vand.u32 4294901760, %v3791_v26  ;;  %v3849_v41 = vsub.f32 %v274_v12, %v295_v15 }
  0x10   :  { %3411 = vmatprep.subr.bf16.mxu0 %v3777_v22  ;;  %3315 = vmatprep.subr.bf16.mxu1 %v3777_v22  ;;  %v3814_v32 = vld [vmem:[%s4982_s1 + $0x40] sm:$0xff]  ;;  %v3819_v33 = vld [vmem:[%s4982_s1 + $0x48] sm:$0xff]  ;;  %v3842_v39 = vld [vmem:[%s4982_s1 + $0x50] sm:$0xff]  ;;  %v3851_v42 = vsub.f32 %v275_v13, %v298_v16  ;;  %v3881_v51 = vsub.f32 %v3742_v9, %v289_v11  ;;  %v3884_v52 = vsub.f32 %v3747_v10, %v292_v14 }
  0x11   :  { %v25_v34 = vld [vmem:[%s4981_s0 + $0x68] sm:$0xff]  ;;  %v24_v35 = vld [vmem:[%s4981_s0 + $0x60] sm:$0xff]  ;;  %v3835_v36 = vpack.c.bf16 %v310_v31, %v307_v30  ;;  %v313_v37 = vand.u32 4294901760, %v3814_v32  ;;  %v316_v38 = vand.u32 4294901760, %v3819_v33  ;;  %v3847_v40 = vld [vmem:[%s4982_s1 + $0x58] sm:$0xff]  ;;  %v319_v43 = vand.u32 4294901760, %v3842_v39 }
  0x12   :  { %108 = vperm.xlu1 %3669, %v21_v20   ;;  %105 = vperm.xlu0 %3668, %v20_v21   ;;  %v706_v44 = vand.u32 4294901760, %v3849_v41  ;;  %v713_v45 = vand.u32 4294901760, %v3851_v42  ;;  %v27_v46 = vld [vmem:[%s4981_s0 + $0x78] sm:$0xff]  ;;  %v26_v47 = vld [vmem:[%s4981_s0 + $0x70] sm:$0xff]  ;;  %v322_v49 = vand.u32 4294901760, %v3847_v40  ;;  %v3876_v50 = vld [vmem:[%s4982_s1 + $0x60] sm:$0xff]  ;;  %v3930_v5 = vsub.f32 %v3760_v17, %v301_v23 }
  0x13   :  { %3413 = vmatpush3.bf16.msra.mxu0 %v3777_v22  ;;  %3317 = vmatpush3.bf16.msra.mxu1 %v3777_v22  ;;  %v3870_v48 = vpack.c.bf16 %v316_v38, %v313_v37  ;;  %v3889_v53 = vld [vmem:[%s4982_s1 + $0x68] sm:$0xff]  ;;  %v325_v57 = vand.u32 4294901760, %v3876_v50  ;;  %v28_v61 = vld [vmem:[%s4981_s0 + $0x80] sm:$0xff]  ;;  %v3916_v0 = vld [vmem:[%s4982_s1 + $0x70] sm:$0xff]  ;;  %v692_v1 = vand.u32 4294901760, %v3881_v51  ;;  %v699_v2 = vand.u32 4294901760, %v3884_v52 }
  0x14   :  { %3415 = vmatprep.subr.bf16.mxu0 %v3807_v29  ;;  %3319 = vmatprep.subr.bf16.mxu1 %v3807_v29  ;;  %v707_v54 = vsub.f32 %v3849_v41, %v706_v44  ;;  %v714_v55 = vsub.f32 %v3851_v42, %v713_v45  ;;  %v3893_v56 = vpack.c.bf16 %v713_v45, %v706_v44  ;;  %v29_v60 = vld [vmem:[%s4981_s0 + $0x88] sm:$0xff]  ;;  %v328_v63 = vand.u32 4294901760, %v3889_v53  ;;  %v3923_v3 = vld [vmem:[%s4982_s1 + $0x78] sm:$0xff]  ;;  %v30_v11 = vld [vmem:[%s4981_s0 + $0x90] sm:$0xff] }
  0x15   :  { %v3910_v62 = vpack.c.bf16 %v322_v49, %v319_v43  ;;  %v3935_v6 = vsub.f32 %v3765_v18, %v304_v24  ;;  %v331_v7 = vand.u32 4294901760, %v3916_v0  ;;  %v720_v8 = vand.u32 4294901760, %v3930_v5  ;;  %v31_v10 = vld [vmem:[%s4981_s0 + $0x98] sm:$0xff]  ;;  %v33_v23 = vld [vmem:[%s4981_s0 + $0xa8] sm:$0xff]  ;;  %v32_v24 = vld [vmem:[%s4981_s0 + $0xa0] sm:$0xff] }
  0x16   :  { %114 = vperm.xlu1 %3669, %v23_v27   ;;  %111 = vperm.xlu0 %3668, %v22_v28   ;;  %v708_v58 = vand.u32 4294901760, %v707_v54  ;;  %v715_v59 = vand.u32 4294901760, %v714_v55  ;;  %v3954_v12 = vpack.c.bf16 %v328_v63, %v325_v57  ;;  %v334_v13 = vand.u32 4294901760, %v3923_v3 }
  0x17   :  { %3417 = vmatpush3.bf16.msra.mxu0 %v3807_v29  ;;  %3321 = vmatpush3.bf16.msra.mxu1 %v3807_v29  ;;  %v727_v9 = vand.u32 4294901760, %v3935_v6  ;;  %v693_v14 = vsub.f32 %v3881_v51, %v692_v1  ;;  %v700_v15 = vsub.f32 %v3884_v52, %v699_v2  ;;  %v721_v16 = vsub.f32 %v3930_v5, %v720_v8 }
  0x18   :  { %3419 = vmatprep.subr.bf16.mxu0 %v3835_v36  ;;  %3323 = vmatprep.subr.bf16.mxu1 %v3835_v36  ;;  %v3925_v4 = vpack.c.bf16 %v715_v59, %v708_v58  ;;  %v3977_v27 = vpack.c.bf16 %v334_v13, %v331_v7  ;;  %v3984_v44 = vsub.f32 %v3786_v25, %v307_v30  ;;  %v35_v25 = vld [vmem:[%s4981_s0 + $0xb8] sm:$0xff]  ;;  %v34_v30 = vld [vmem:[%s4981_s0 + $0xb0] sm:$0xff] }
  0x19   :  { %v728_v17 = vsub.f32 %v3935_v6, %v727_v9  ;;  %v3961_v18 = vpack.c.bf16 %v727_v9, %v720_v8  ;;  %v722_v20 = vand.u32 4294901760, %v721_v16  ;;  %v694_v28 = vand.u32 4294901760, %v693_v14  ;;  %v39_v14 = vld [vmem:[%s4981_s0 + $0xd8] sm:$0xff] }
  0x1a   :  { %120 = vperm.xlu1 %3669, %v25_v34   ;;  %117 = vperm.xlu0 %3668, %v24_v35   ;;  %v701_v34 = vand.u32 4294901760, %v700_v15  ;;  %v3989_v45 = vsub.f32 %v3791_v26, %v310_v31  ;;  %v4005_v31 = vpack.c.bf16 %v699_v2, %v692_v1  ;;  %v36_v1 = vld [vmem:[%s4981_s0 + $0xc0] sm:$0xff]  ;;  %v747_v8 = vsub.f32 %v3814_v32, %v313_v37  ;;  %v38_v15 = vld [vmem:[%s4981_s0 + $0xd0] sm:$0xff]  ;;  %v41_v37 = vld [vmem:[%s4981_s0 + $0xe8] sm:$0xff] }
  0x1b   :  { %3421 = vmatpush3.bf16.msra.mxu0 %v3835_v36  ;;  %3325 = vmatpush3.bf16.msra.mxu1 %v3835_v36  ;;  %v729_v21 = vand.u32 4294901760, %v728_v17  ;;  %v754_v9 = vsub.f32 %v3819_v33, %v316_v38  ;;  %v40_v38 = vld [vmem:[%s4981_s0 + $0xe0] sm:$0xff] }
  0x1c   :  { %3423 = vmatprep.subr.bf16.mxu0 %v3870_v48  ;;  %3327 = vmatprep.subr.bf16.mxu1 %v3870_v48  ;;  %v4003_v26 = vpack.c.bf16 %v701_v34, %v694_v28 }
  0x1d   :  { %v3979_v35 = vpack.c.bf16 %v729_v21, %v722_v20 }
  0x1e   :  { %126 = vperm.xlu1 %3669, %v27_v46   ;;  %123 = vperm.xlu0 %3668, %v26_v47   ;;  %v734_v46 = vand.u32 4294901760, %v3984_v44  ;;  %v741_v47 = vand.u32 4294901760, %v3989_v45 }
  0x1f   :  { %3425 = vmatpush3.bf16.msra.mxu0 %v3870_v48  ;;  %3329 = vmatpush3.bf16.msra.mxu1 %v3870_v48 }
  0x20   :  { %3427 = vmatprep.subr.bf16.mxu0 %v3910_v62  ;;  %3331 = vmatprep.subr.bf16.mxu1 %v3910_v62  ;;  %v735_v54 = vsub.f32 %v3984_v44, %v734_v46  ;;  %v742_v55 = vsub.f32 %v3989_v45, %v741_v47  ;;  %v4009_v58 = vpack.c.bf16 %v741_v47, %v734_v46  ;;  %v43_v46 = vld [vmem:[%s4981_s0 + $0xf8] sm:$0xff]  ;;  %v42_v47 = vld [vmem:[%s4981_s0 + $0xf0] sm:$0xff] }
  0x22   :  { %132 = vperm.xlu1 %3669, %v29_v60   ;;  %129 = vperm.xlu0 %3668, %v28_v61   ;;  %v736_v59 = vand.u32 4294901760, %v735_v54  ;;  %v743_v60 = vand.u32 4294901760, %v742_v55  ;;  %v37_v61 = vld [vmem:[%s4981_s0 + $0xc8] sm:$0xff]  ;;  %s3697_s0 = smov [#allocation2]  }
  0x23   :  { %3429 = vmatpush3.bf16.msra.mxu0 %v3910_v62  ;;  %3333 = vmatpush3.bf16.msra.mxu1 %v3910_v62  ;;  %s2403_s20 = sshll.u32 %s3697_s0, 4  ;;  %s2404_s20 = int_to_ptr.vmem [resolvable:$true] %s2403_s20 }
  0x24   :  { %3431 = vmatprep.subr.bf16.mxu0 %v3954_v12  ;;  %3335 = vmatprep.subr.bf16.mxu1 %v3954_v12  ;;  %v4021_v2 = vpack.c.bf16 %v743_v60, %v736_v59  ;;  %s3670_s1 = scalar_lea.vmem %s2404_s20, 4096  ;;  %p3675_p1 = scmp.lt.s32.totalorder %s2404_s20, %s2404_s20 }
  0x25   :  { %p3671_p0 = scmp.ne.s32.totalorder %s2404_s20, %s3670_s1  ;;  %p3676_p2 = scmp.lt.s32.totalorder %s3670_s1, %s3670_s1 }
  0x26   :  { %138 = vperm.xlu1 %3669, %v31_v10   ;;  %135 = vperm.xlu0 %3668, %v30_v11   ;;  %v748_v10 = vand.u32 4294901760, %v747_v8  ;;  %v755_v11 = vand.u32 4294901760, %v754_v9 }
  0x27   :  { %3433 = vmatpush3.bf16.msra.mxu0 %v3954_v12  ;;  %3337 = vmatpush3.bf16.msra.mxu1 %v3954_v12  ;;  %p3677_p3 = por %p3676_p2, %p3675_p1 }
  0x28   :  { %3435 = vmatprep.subr.bf16.mxu0 %v3977_v27  ;;  %3339 = vmatprep.subr.bf16.mxu1 %v3977_v27  ;;  %v749_v16 = vsub.f32 %v747_v8, %v748_v10  ;;  %v756_v17 = vsub.f32 %v754_v9, %v755_v11  ;;  %v4035_v20 = vpack.c.bf16 %v755_v11, %v748_v10 }
  0x29   :  { %v789_v11 = vsub.f32 %v3916_v0, %v331_v7  ;;  %v4083_v0 = vpack.c.bf16 %v3884_v52, %v3881_v51  ;;  %v4091_v7 = vpack.c.bf16 %v3935_v6, %v3930_v5  ;;  %p3678_p4 = pnand %p3677_p3, %p3671_p0 }
  0x2a   :  { %144 = vperm.xlu1 %3669, %v33_v23   ;;  %141 = vperm.xlu0 %3668, %v32_v24   ;;  %v750_v32 = vand.u32 4294901760, %v749_v16  ;;  %v757_v33 = vand.u32 4294901760, %v756_v17  ;;  %v761_v23 = vsub.f32 %v3842_v39, %v319_v43  ;;  %v768_v24 = vsub.f32 %v3847_v40, %v322_v49 }
  0x2b   :  { %3437 = vmatpush3.bf16.msra.mxu0 %v3977_v27  ;;  %3341 = vmatpush3.bf16.msra.mxu1 %v3977_v27  ;;  %v775_v43 = vsub.f32 %v3876_v50, %v325_v57  ;;  %v782_v49 = vsub.f32 %v3889_v53, %v328_v63  ;;  %v796_v50 = vsub.f32 %v3923_v3, %v334_v13 }
  0x2c   :  { %3343 = vmatprep.subr.bf16.mxu1 %v4003_v26  ;;  %3439 = vmatprep.subr.bf16.mxu0 %v4005_v31  ;;  %v4043_v21 = vpack.c.bf16 %v757_v33, %v750_v32  ;;  %v762_v28 = vand.u32 4294901760, %v761_v23  ;;  %v769_v34 = vand.u32 4294901760, %v768_v24  ;;  %v4087_v3 = vpack.c.bf16 %v3851_v42, %v3849_v41 }
  0x2d   :  { %v776_v59 = vand.u32 4294901760, %v775_v43  ;;  %v783_v60 = vand.u32 4294901760, %v782_v49  ;;  %v797_v53 = vand.u32 4294901760, %v796_v50  ;;  %v4095_v13 = vpack.c.bf16 %v3989_v45, %v3984_v44 }
  0x2e   :  { %150 = vperm.xlu1 %3669, %v35_v25   ;;  %147 = vperm.xlu0 %3668, %v34_v30   ;;  %v763_v25 = vsub.f32 %v761_v23, %v762_v28  ;;  %v770_v30 = vsub.f32 %v768_v24, %v769_v34  ;;  %v4057_v54 = vpack.c.bf16 %v769_v34, %v762_v28  ;;  %v4984_v42 = vmov 0.0  }
  0x2f   :  { %v4067_v10 = vpack.c.bf16 %v783_v60, %v776_v59  ;;  %v798_v17 = vsub.f32 %v796_v50, %v797_v53  ;;  %v4097_v28 = vpack.c.bf16 %v754_v9, %v747_v8  ;;  %v4099_v34 = vpack.c.bf16 %v768_v24, %v761_v23 }
  0x30   :  { %v764_v39 = vand.u32 4294901760, %v763_v25  ;;  %v771_v40 = vand.u32 4294901760, %v770_v30  ;;  %v4129_v23 = vpack.c.bf16 %v796_v50, %v789_v11 }
  0x32   :  { %156 = vperm.xlu1 %3669, %v37_v61   ;;  %153 = vperm.xlu0 %3668, %v36_v1   ;;  %v4065_v55 = vpack.c.bf16 %v771_v40, %v764_v39  ;;  %v777_v61 = vsub.f32 %v775_v43, %v776_v59  ;;  %v784_v1 = vsub.f32 %v782_v49, %v783_v60 }
  0x34   :  { %v778_v57 = vand.u32 4294901760, %v777_v61 }
  0x36   :  { %162 = vperm.xlu1 %3669, %v39_v14   ;;  %159 = vperm.xlu0 %3668, %v38_v15   ;;  %v785_v14 = vand.u32 4294901760, %v784_v1  ;;  %v790_v15 = vand.u32 4294901760, %v789_v11 }
  0x38   :  { %v4075_v63 = vpack.c.bf16 %v785_v14, %v778_v57  ;;  %v791_v16 = vsub.f32 %v789_v11, %v790_v15  ;;  %v4077_v32 = vpack.c.bf16 %v797_v53, %v790_v15 }
  0x3a   :  { %168 = vperm.xlu1 %3669, %v41_v37   ;;  %165 = vperm.xlu0 %3668, %v40_v38   ;;  %v792_v33 = vand.u32 4294901760, %v791_v16  ;;  %v799_v37 = vand.u32 4294901760, %v798_v17 }
  0x3c   :  { %v4079_v38 = vpack.c.bf16 %v799_v37, %v792_v33 }
  0x3e   :  { %174 = vperm.xlu1 %3669, %v43_v46   ;;  %171 = vperm.xlu0 %3668, %v42_v47   ;;  %v78_v46 = vlaneseq  ;;  %v4101_v47 = vpack.c.bf16 %v782_v49, %v775_v43 }
  0x40   :  { %v4103_v51 = vand.u32 127, %v78_v46 }
  0x81   :  { %v4105_v52 = vpop.permute.xlu1 %87  ;;  %v4107_v41 = vpop.permute.xlu0 %81 }
  0x82   :  { %vm178_vm0 = vcmp.eq.s32.totalorder %v4103_v51, %v4105_v52  ;;  %vm176_vm1 = vcmp.eq.s32.totalorder %v4103_v51, %v4107_v41 }
  0x83   :  { %v2416_v5 = vsel %vm178_vm0, 1.0, %v4984_v42  ;;  %v2414_v6 = vsel %vm176_vm1, 1.0, %v4984_v42 }
  0x84   :  { %v4121_v44 = vsub.f32 %v2416_v5, %v2416_v5  ;;  %v4123_v45 = vsub.f32 %v2414_v6, %v2414_v6 }
  0x85   :  { %v4125_v8 = vpop.permute.xlu1 %90  ;;  %v4127_v9 = vpop.permute.xlu0 %84 }
  0x86   :  { %5041 = vst [vmem:[#allocation5_spill] sm:$0xff] %v4121_v44  ;;  %5042 = vst [vmem:[#allocation6_spill] sm:$0xff] %v4123_v45  ;;  %vm179_vm2 = vcmp.eq.s32.totalorder %v4103_v51, %v4125_v8  ;;  %vm177_vm3 = vcmp.eq.s32.totalorder %v4103_v51, %v4127_v9  ;;  %v371_v24 = vand.u32 4294901760, %v4123_v45  ;;  %v391_v39 = vand.u32 4294901760, %v4121_v44 }
  0x87   :  { %v2417_v25 = vsel %vm179_vm2, 1.0, %v4984_v42  ;;  %v2415_v30 = vsel %vm177_vm3, 1.0, %v4984_v42 }
  0x88   :  { %v4145_v40 = vsub.f32 %v2417_v25, %v2417_v25  ;;  %v4147_v43 = vsub.f32 %v2415_v30, %v2415_v30  ;;  %3102 = vmatprep.mubr.f32.mxu0 %v371_v24  ;;  %v372_v49 = vsub.f32 %v4123_v45, %v371_v24  ;;  %v392_v14 = vsub.f32 %v4121_v44, %v391_v39 }
  0x89   :  { %v4150_v59 = vpop.permute.xlu1 %96  ;;  %v4152_v60 = vpop.permute.xlu0 %93 }
  0x8a   :  { %5043 = vst [vmem:[#allocation7_spill] sm:$0xff] %v4145_v40  ;;  %5044 = vst [vmem:[#allocation8_spill] sm:$0xff] %v4147_v43  ;;  %vm181_vm4 = vcmp.eq.s32.totalorder %v4103_v51, %v4150_v59  ;;  %vm180_vm5 = vcmp.eq.s32.totalorder %v4103_v51, %v4152_v60  ;;  %v373_v61 = vand.u32 4294901760, %v372_v49  ;;  %v381_v1 = vand.u32 4294901760, %v4147_v43 }
  0x8b   :  { %v2419_v11 = vsel %vm181_vm4, 1.0, %v4984_v42  ;;  %v2418_v50 = vsel %vm180_vm5, 1.0, %v4984_v42  ;;  %v401_v57 = vand.u32 4294901760, %v4145_v40  ;;  %v393_v24 = vand.u32 4294901760, %v392_v14 }
  0x8c   :  { %v4169_v15 = vsub.f32 %v2419_v11, %v2419_v11  ;;  %v4171_v53 = vsub.f32 %v2418_v50, %v2418_v50  ;;  %2862 = vmatprep.mubr.f32.mxu1 %v373_v61  ;;  %3103 = vmatmul.mubr.f32.vlgmr.msra.gmra.mrb[0].mxu0 %v381_v1  ;;  %v382_v16 = vsub.f32 %v4147_v43, %v381_v1 }
  0x8d   :  { %v4174_v17 = vpop.permute.xlu1 %102  ;;  %3105 = vmatprep.mubr.f32.mxu0 %v391_v39  ;;  %v4176_v33 = vpop.permute.xlu0 %99  ;;  %3441 = vmatpush3.bf16.msra.mxu0 %v4005_v31  ;;  %v402_v37 = vsub.f32 %v4145_v40, %v401_v57 }
  0x8e   :  { %5045 = vst [vmem:[#allocation9_spill] sm:$0xff] %v4169_v15  ;;  %5046 = vst [vmem:[#allocation10_spill] sm:$0xff] %v4171_v53  ;;  %vm183_vm6 = vcmp.eq.s32.totalorder %v4103_v51, %v4174_v17  ;;  %vm182_vm7 = vcmp.eq.s32.totalorder %v4103_v51, %v4176_v33  ;;  %v383_v46 = vand.u32 4294901760, %v382_v16  ;;  %v411_v5 = vand.u32 4294901760, %v4171_v53  ;;  %3443 = vmatprep.subr.bf16.mxu0 %v3893_v56 }
  0x8f   :  { %v2421_v6 = vsel %vm183_vm6, 1.0, %v4984_v42  ;;  %v2420_v31 = vsel %vm182_vm7, 1.0, %v4984_v42  ;;  %v421_v25 = vand.u32 4294901760, %v4169_v15  ;;  %v403_v11 = vand.u32 4294901760, %v402_v37 }
  0x90   :  { %v4195_v30 = vsub.f32 %v2421_v6, %v2421_v6  ;;  %v4197_v39 = vsub.f32 %v2420_v31, %v2420_v31  ;;  %2863 = vmatmul.mubr.f32.vlgmr.msra.gmra.mrb[0].mxu1 %v383_v46  ;;  %3106 = vmatmul.mubr.f32.gmra.mrb[2].mxu0 %v401_v57  ;;  %v412_v49 = vsub.f32 %v4171_v53, %v411_v5 }
  0x91   :  { %3345 = vmatpush3.bf16.msra.mxu1 %v4003_v26  ;;  %v4201_v61 = vpop.permute.xlu1 %108  ;;  %2865 = vmatprep.mubr.f32.mxu1 %v393_v24  ;;  %v4203_v1 = vpop.permute.xlu0 %105  ;;  %v422_v50 = vsub.f32 %v4169_v15, %v421_v25 }
  0x92   :  { %5047 = vst [vmem:[#allocation11_spill] sm:$0xff] %v4195_v30  ;;  %5048 = vst [vmem:[#allocation12_spill] sm:$0xff] %v4197_v39  ;;  %vm5040_vm8 = vcmp.eq.s32.totalorder %v4103_v51, %v4201_v61  ;;  %3108 = vmatprep.mubr.f32.mxu0 %v411_v5  ;;  %vm184_vm9 = vcmp.eq.s32.totalorder %v4103_v51, %v4203_v1  ;;  %v413_v57 = vand.u32 4294901760, %v412_v49  ;;  %v431_v14 = vand.u32 4294901760, %v4197_v39 }
  0x93   :  { %3347 = vmatprep.subr.bf16.mxu1 %v3925_v4  ;;  %v2423_v26 = vsel %vm5040_vm8, 1.0, %v4984_v42  ;;  %v2422_v16 = vsel %vm184_vm9, 1.0, %v4984_v42  ;;  %v441_v37 = vand.u32 4294901760, %v4195_v30  ;;  %3445 = vmatpush3.bf16.msra.mxu0 %v3893_v56  ;;  %v423_v49 = vand.u32 4294901760, %v422_v50 }
  0x94   :  { %v4222_v46 = vsub.f32 %v2423_v26, %v2423_v26  ;;  %v4224_v5 = vsub.f32 %v2422_v16, %v2422_v16  ;;  %2866 = vmatmul.mubr.f32.gmra.mrb[2].mxu1 %v403_v11  ;;  %3109 = vmatmul.mubr.f32.gmra.mrb[4].mxu0 %v421_v25  ;;  %v432_v6 = vsub.f32 %v4197_v39, %v431_v14  ;;  %v5051_v11 = vmov 0.0  }
  0x95   :  { %v4227_v31 = vpop.permute.xlu1 %114  ;;  %2868 = vmatprep.mubr.f32.mxu1 %v413_v57  ;;  %3111 = vmatprep.mubr.f32.mxu0 %v431_v14  ;;  %v4229_v24 = vpop.permute.xlu0 %111  ;;  %v442_v42 = vsub.f32 %v4195_v30, %v441_v37 }
  0x96   :  { %5049 = vst [vmem:[#allocation13_spill] sm:$0xff] %v4222_v46  ;;  %5050 = vst [vmem:[#allocation14_spill] sm:$0xff] %v4224_v5  ;;  %vm5038_vm10 = vcmp.eq.s32.totalorder %v4103_v51, %v4227_v31  ;;  %vm5036_vm11 = vcmp.eq.s32.totalorder %v4103_v51, %v4229_v24  ;;  %3349 = vmatpush3.bf16.msra.mxu1 %v3925_v4  ;;  %v433_v56 = vand.u32 4294901760, %v432_v6  ;;  %v451_v25 = vand.u32 4294901760, %v4224_v5 }
  0x97   :  { %3447 = vmatprep.subr.bf16.mxu0 %v3961_v18  ;;  %v2425_v50 = vsel %vm5038_vm10, 1.0, %v5051_v11  ;;  %v2424_v57 = vsel %vm5036_vm11, 1.0, %v5051_v11  ;;  %v461_v14 = vand.u32 4294901760, %v4222_v46  ;;  %3351 = vmatprep.subr.bf16.mxu1 %v3979_v35  ;;  %v443_v39 = vand.u32 4294901760, %v442_v42 }
  0x98   :  { %3449 = vmatpush3.bf16.msra.mxu0 %v3961_v18  ;;  %v4250_v4 = vsub.f32 %v2425_v50, %v2425_v50  ;;  %v4252_v26 = vsub.f32 %v2424_v57, %v2424_v57  ;;  %2869 = vmatmul.mubr.f32.gmra.mrb[4].mxu1 %v423_v49  ;;  %v452_v16 = vsub.f32 %v4224_v5, %v451_v25 }
  0x99   :  { %3112 = vmatmul.mubr.f32.gmra.mrb[6].mxu0 %v441_v37  ;;  %v4255_v6 = vpop.permute.xlu1 %120  ;;  %2871 = vmatprep.mubr.f32.mxu1 %v433_v56  ;;  %v4257_v30 = vpop.permute.xlu0 %117  ;;  %v462_v15 = vsub.f32 %v4222_v46, %v461_v14 }
  0x9a   :  { %5052 = vst [vmem:[#allocation15_spill] sm:$0xff] %v4250_v4  ;;  %5053 = vst [vmem:[#allocation16_spill] sm:$0xff] %v4252_v26  ;;  %3114 = vmatprep.mubr.f32.mxu0 %v451_v25  ;;  %vm5039_vm12 = vcmp.eq.s32.totalorder %v4103_v51, %v4255_v6  ;;  %vm5037_vm13 = vcmp.eq.s32.totalorder %v4103_v51, %v4257_v30  ;;  %v453_v18 = vand.u32 4294901760, %v452_v16  ;;  %v471_v37 = vand.u32 4294901760, %v4252_v26 }
  0x9b   :  { %3353 = vmatpush3.bf16.msra.mxu1 %v3979_v35  ;;  %3451 = vmatprep.subr.bf16.mxu0 %v4009_v58  ;;  %v2427_v42 = vsel %vm5039_vm12, 1.0, %v5051_v11  ;;  %v2426_v49 = vsel %vm5037_vm13, 1.0, %v5051_v11  ;;  %v481_v56 = vand.u32 4294901760, %v4250_v4  ;;  %v463_v46 = vand.u32 4294901760, %v462_v15 }
  0x9c   :  { %3355 = vmatprep.subr.bf16.mxu1 %v4021_v2  ;;  %3453 = vmatpush3.bf16.msra.mxu0 %v4009_v58  ;;  %v4278_v25 = vsub.f32 %v2427_v42, %v2427_v42  ;;  %v4280_v35 = vsub.f32 %v2426_v49, %v2426_v49  ;;  %v472_v50 = vsub.f32 %v4252_v26, %v471_v37 }
  0x9d   :  { %2872 = vmatmul.mubr.f32.gmra.mrb[6].mxu1 %v443_v39  ;;  %3115 = vmatmul.mubr.f32.gmra.mrb[8].mxu0 %v461_v14  ;;  %v4283_v57 = vpop.permute.xlu1 %126  ;;  %v4285_v16 = vpop.permute.xlu0 %123  ;;  %v482_v5 = vsub.f32 %v4250_v4, %v481_v56 }
  0x9e   :  { %5054 = vst [vmem:[#allocation17_spill] sm:$0xff] %v4278_v25  ;;  %5055 = vst [vmem:[#allocation18_spill] sm:$0xff] %v4280_v35  ;;  %2874 = vmatprep.mubr.f32.mxu1 %v453_v18  ;;  %3117 = vmatprep.mubr.f32.mxu0 %v471_v37  ;;  %vm4993_vm14 = vcmp.eq.s32.totalorder %v4103_v51, %v4283_v57  ;;  %vm4994_vm15 = vcmp.eq.s32.totalorder %v4103_v51, %v4285_v16  ;;  %v473_v58 = vand.u32 4294901760, %v472_v50 }
  0x9f   :  { %v491_v39 = vand.u32 4294901760, %v4280_v35  ;;  %3357 = vmatpush3.bf16.msra.mxu1 %v4021_v2  ;;  %3455 = vmatprep.subr.bf16.mxu0 %v4035_v20  ;;  %v2429_v15 = vsel %vm4993_vm14, 1.0, %v5051_v11  ;;  %v2428_v14 = vsel %vm4994_vm15, 1.0, %v5051_v11  ;;  %v501_v18 = vand.u32 4294901760, %v4278_v25 }
  0xa0   :  { %3359 = vmatprep.subr.bf16.mxu1 %v4043_v21  ;;  %3457 = vmatpush3.bf16.msra.mxu0 %v4035_v20  ;;  %v4306_v37 = vsub.f32 %v2429_v15, %v2429_v15  ;;  %v4308_v2 = vsub.f32 %v2428_v14, %v2428_v14  ;;  %v483_v4 = vand.u32 4294901760, %v482_v5 }
  0xa1   :  { %2875 = vmatmul.mubr.f32.gmra.mrb[8].mxu1 %v463_v46  ;;  %3118 = vmatmul.mubr.f32.gmra.mrb[10].mxu0 %v481_v56  ;;  %v492_v42 = vsub.f32 %v4280_v35, %v491_v39  ;;  %v4311_v49 = vpop.permute.xlu1 %132  ;;  %v4313_v50 = vpop.permute.xlu0 %129  ;;  %v502_v26 = vsub.f32 %v4278_v25, %v501_v18 }
  0xa2   :  { %5056 = vst [vmem:[#allocation19_spill] sm:$0xff] %v4306_v37  ;;  %5057 = vst [vmem:[#allocation20_spill] sm:$0xff] %v4308_v2  ;;  %2877 = vmatprep.mubr.f32.mxu1 %v473_v58  ;;  %3120 = vmatprep.mubr.f32.mxu0 %v491_v39  ;;  %vm4997_vm14 = vcmp.eq.s32.totalorder %v4103_v51, %v4311_v49  ;;  %vm4998_vm15 = vcmp.eq.s32.totalorder %v4103_v51, %v4313_v50  ;;  %v511_v46 = vand.u32 4294901760, %v4308_v2 }
  0xa3   :  { %v493_v20 = vand.u32 4294901760, %v492_v42  ;;  %3361 = vmatpush3.bf16.msra.mxu1 %v4043_v21  ;;  %3459 = vmatprep.subr.bf16.mxu0 %v4057_v54  ;;  %v2431_v5 = vsel %vm4997_vm14, 1.0, %v5051_v11  ;;  %v2430_v56 = vsel %vm4998_vm15, 1.0, %v5051_v11  ;;  %v521_v58 = vand.u32 4294901760, %v4306_v37 }
  0xa4   :  { %3363 = vmatprep.subr.bf16.mxu1 %v4065_v55  ;;  %3461 = vmatpush3.bf16.msra.mxu0 %v4057_v54  ;;  %v4334_v39 = vsub.f32 %v2431_v5, %v2431_v5  ;;  %v4336_v21 = vsub.f32 %v2430_v56, %v2430_v56  ;;  %v512_v15 = vsub.f32 %v4308_v2, %v511_v46  ;;  %v503_v25 = vand.u32 4294901760, %v502_v26 }
  0xa5   :  { %2878 = vmatmul.mubr.f32.gmra.mrb[10].mxu1 %v483_v4  ;;  %3121 = vmatmul.mubr.f32.gmra.mrb[12].mxu0 %v501_v18  ;;  %v4339_v14 = vpop.permute.xlu1 %138  ;;  %v4341_v42 = vpop.permute.xlu0 %135  ;;  %v522_v35 = vsub.f32 %v4306_v37, %v521_v58  ;;  %v5122_v52 = vld [vmem:[#allocation18_spill] sm:$0xff]  ;;  %v5124_v41 = vld [vmem:[#allocation17_spill] sm:$0xff] }
  0xa6   :  { %5058 = vst [vmem:[#allocation21_spill] sm:$0xff] %v4334_v39  ;;  %5059 = vst [vmem:[#allocation22_spill] sm:$0xff] %v4336_v21  ;;  %2880 = vmatprep.mubr.f32.mxu1 %v493_v20  ;;  %3123 = vmatprep.mubr.f32.mxu0 %v511_v46  ;;  %vm5001_vm14 = vcmp.eq.s32.totalorder %v4103_v51, %v4339_v14  ;;  %vm5002_vm15 = vcmp.eq.s32.totalorder %v4103_v51, %v4341_v42  ;;  %v513_v54 = vand.u32 4294901760, %v512_v15 }
  0xa7   :  { %v531_v4 = vand.u32 4294901760, %v4336_v21  ;;  %3365 = vmatpush3.bf16.msra.mxu1 %v4065_v55  ;;  %3463 = vmatprep.subr.bf16.mxu0 %v4067_v10  ;;  %v2433_v26 = vsel %vm5001_vm14, 1.0, %v5051_v11  ;;  %v2432_v18 = vsel %vm5002_vm15, 1.0, %v5051_v11  ;;  %v541_v20 = vand.u32 4294901760, %v4334_v39 }
  0xa8   :  { %3367 = vmatprep.subr.bf16.mxu1 %v4075_v63  ;;  %3465 = vmatpush3.bf16.msra.mxu0 %v4067_v10  ;;  %v4362_v46 = vsub.f32 %v2433_v26, %v2433_v26  ;;  %v4364_v55 = vsub.f32 %v2432_v18, %v2432_v18  ;;  %v523_v37 = vand.u32 4294901760, %v522_v35 }
  0xa9   :  { %2881 = vmatmul.mubr.f32.gmra.mrb[12].mxu1 %v503_v25  ;;  %3124 = vmatmul.mubr.f32.gmra.mrb[14].mxu0 %v521_v58  ;;  %v532_v5 = vsub.f32 %v4336_v21, %v531_v4  ;;  %v4367_v56 = vpop.permute.xlu1 %144  ;;  %v4369_v15 = vpop.permute.xlu0 %141  ;;  %v542_v2 = vsub.f32 %v4334_v39, %v541_v20  ;;  %v5126_v8 = vld [vmem:[#allocation20_spill] sm:$0xff]  ;;  %v5128_v9 = vld [vmem:[#allocation19_spill] sm:$0xff] }
  0xaa   :  { %5060 = vst [vmem:[#allocation23_spill] sm:$0xff] %v4362_v46  ;;  %5061 = vst [vmem:[#allocation24_spill] sm:$0xff] %v4364_v55  ;;  %2883 = vmatprep.mubr.f32.mxu1 %v513_v54  ;;  %3126 = vmatprep.mubr.f32.mxu0 %v531_v4  ;;  %vm5005_vm14 = vcmp.eq.s32.totalorder %v4103_v51, %v4367_v56  ;;  %vm5006_vm15 = vcmp.eq.s32.totalorder %v4103_v51, %v4369_v15  ;;  %v551_v25 = vand.u32 4294901760, %v4364_v55 }
  0xab   :  { %v533_v10 = vand.u32 4294901760, %v532_v5  ;;  %3369 = vmatpush3.bf16.msra.mxu1 %v4075_v63  ;;  %3467 = vmatprep.subr.bf16.mxu0 %v4077_v32  ;;  %v2435_v35 = vsel %vm5005_vm14, 1.0, %v5051_v11  ;;  %v2434_v58 = vsel %vm5006_vm15, 1.0, %v5051_v11  ;;  %v561_v54 = vand.u32 4294901760, %v4362_v46 }
  0xac   :  { %3371 = vmatprep.subr.bf16.mxu1 %v4079_v38  ;;  %3469 = vmatpush3.bf16.msra.mxu0 %v4077_v32  ;;  %v4390_v4 = vsub.f32 %v2435_v35, %v2435_v35  ;;  %v4392_v63 = vsub.f32 %v2434_v58, %v2434_v58  ;;  %v552_v26 = vsub.f32 %v4364_v55, %v551_v25  ;;  %v543_v39 = vand.u32 4294901760, %v542_v2 }
  0xad   :  { %2884 = vmatmul.mubr.f32.gmra.mrb[14].mxu1 %v523_v37  ;;  %3127 = vmatmul.mubr.f32.gmra.mrb[16].mxu0 %v541_v20  ;;  %v4395_v18 = vpop.permute.xlu1 %150  ;;  %v4397_v5 = vpop.permute.xlu0 %147  ;;  %v562_v21 = vsub.f32 %v4362_v46, %v561_v54  ;;  %v5132_v59 = vld [vmem:[#allocation21_spill] sm:$0xff] }
  0xae   :  { %5062 = vst [vmem:[#allocation25_spill] sm:$0xff] %v4390_v4  ;;  %5063 = vst [vmem:[#allocation26_spill] sm:$0xff] %v4392_v63  ;;  %2886 = vmatprep.mubr.f32.mxu1 %v533_v10  ;;  %3129 = vmatprep.mubr.f32.mxu0 %v551_v25  ;;  %vm5009_vm14 = vcmp.eq.s32.totalorder %v4103_v51, %v4395_v18  ;;  %vm5010_vm15 = vcmp.eq.s32.totalorder %v4103_v51, %v4397_v5  ;;  %v553_v32 = vand.u32 4294901760, %v552_v26 }
  0xaf   :  { %v571_v37 = vand.u32 4294901760, %v4392_v63  ;;  %3373 = vmatpush3.bf16.msra.mxu1 %v4079_v38  ;;  %3471 = vmatprep.subr.bf16.mxu0 %v3769_v19  ;;  %v2437_v2 = vsel %vm5009_vm14, 1.0, %v5051_v11  ;;  %v2436_v20 = vsel %vm5010_vm15, 1.0, %v5051_v11  ;;  %v581_v10 = vand.u32 4294901760, %v4390_v4 }
  0xb0   :  { %3375 = vmatprep.subr.bf16.mxu1 %v4083_v0  ;;  %v4417_v25 = vsub.f32 %v2437_v2, %v2437_v2  ;;  %v4419_v35 = vsub.f32 %v2436_v20, %v2436_v20  ;;  %v563_v46 = vand.u32 4294901760, %v562_v21 }
  0xb1   :  { %2887 = vmatmul.mubr.f32.gmra.mrb[16].mxu1 %v543_v39  ;;  %3130 = vmatmul.mubr.f32.gmra.mrb[18].mxu0 %v561_v54  ;;  %v572_v38 = vsub.f32 %v4392_v63, %v571_v37  ;;  %v4422_v58 = vpop.permute.xlu1 %156  ;;  %v4424_v26 = vpop.permute.xlu0 %153  ;;  %v582_v55 = vsub.f32 %v4390_v4, %v581_v10  ;;  %v5134_v60 = vld [vmem:[#allocation24_spill] sm:$0xff]  ;;  %v5136_v17 = vld [vmem:[#allocation23_spill] sm:$0xff] }
  0xb2   :  { %5064 = vst [vmem:[#allocation27_spill] sm:$0xff] %v4417_v25  ;;  %5065 = vst [vmem:[#allocation28_spill] sm:$0xff] %v4419_v35  ;;  %2889 = vmatprep.mubr.f32.mxu1 %v553_v32  ;;  %3132 = vmatprep.mubr.f32.mxu0 %v571_v37  ;;  %vm5015_vm14 = vcmp.eq.s32.totalorder %v4103_v51, %v4422_v58  ;;  %vm5016_vm15 = vcmp.eq.s32.totalorder %v4103_v51, %v4424_v26  ;;  %v591_v39 = vand.u32 4294901760, %v4419_v35 }
  0xb3   :  { %v573_v2 = vand.u32 4294901760, %v572_v38  ;;  %v2439_v54 = vsel %vm5015_vm14, 1.0, %v5051_v11  ;;  %v2438_v21 = vsel %vm5016_vm15, 1.0, %v5051_v11  ;;  %v601_v32 = vand.u32 4294901760, %v4417_v25 }
  0xb4   :  { %v4441_v37 = vsub.f32 %v2439_v54, %v2439_v54  ;;  %v4443_v20 = vsub.f32 %v2438_v21, %v2438_v21  ;;  %v592_v38 = vsub.f32 %v4419_v35, %v591_v39  ;;  %v583_v53 = vand.u32 4294901760, %v582_v55 }
  0xb5   :  { %2890 = vmatmul.mubr.f32.gmra.mrb[18].mxu1 %v563_v46  ;;  %3133 = vmatmul.mubr.f32.gmra.mrb[20].mxu0 %v581_v10  ;;  %v4446_v4 = vpop.permute.xlu1 %162  ;;  %v4448_v63 = vpop.permute.xlu0 %159  ;;  %v602_v40 = vsub.f32 %v4417_v25, %v601_v32  ;;  %v5138_v33 = vld [vmem:[#allocation26_spill] sm:$0xff] }
  0xb6   :  { %5066 = vst [vmem:[#allocation29_spill] sm:$0xff] %v4441_v37  ;;  %5067 = vst [vmem:[#allocation30_spill] sm:$0xff] %v4443_v20  ;;  %2892 = vmatprep.mubr.f32.mxu1 %v573_v2  ;;  %3135 = vmatprep.mubr.f32.mxu0 %v591_v39  ;;  %vm5021_vm14 = vcmp.eq.s32.totalorder %v4103_v51, %v4446_v4  ;;  %vm5022_vm15 = vcmp.eq.s32.totalorder %v4103_v51, %v4448_v63  ;;  %v593_v54 = vand.u32 4294901760, %v592_v38 }
  0xb7   :  { %v611_v46 = vand.u32 4294901760, %v4443_v20  ;;  %v2441_v10 = vsel %vm5021_vm14, 1.0, %v5051_v11  ;;  %v2440_v55 = vsel %vm5022_vm15, 1.0, %v5051_v11  ;;  %v621_v2 = vand.u32 4294901760, %v4441_v37 }
  0xb8   :  { %v4465_v39 = vsub.f32 %v2441_v10, %v2441_v10  ;;  %v4467_v21 = vsub.f32 %v2440_v55, %v2440_v55  ;;  %v603_v44 = vand.u32 4294901760, %v602_v40 }
  0xb9   :  { %2893 = vmatmul.mubr.f32.gmra.mrb[20].mxu1 %v583_v53  ;;  %3136 = vmatmul.mubr.f32.gmra.mrb[22].mxu0 %v601_v32  ;;  %v612_v38 = vsub.f32 %v4443_v20, %v611_v46  ;;  %v4470_v25 = vpop.permute.xlu1 %168  ;;  %v4472_v35 = vpop.permute.xlu0 %165  ;;  %v622_v43 = vsub.f32 %v4441_v37, %v621_v2  ;;  %v5144_v1 = vld [vmem:[#allocation27_spill] sm:$0xff] }
  0xba   :  { %5068 = vst [vmem:[#allocation31_spill] sm:$0xff] %v4465_v39  ;;  %5069 = vst [vmem:[#allocation32_spill] sm:$0xff] %v4467_v21  ;;  %2895 = vmatprep.mubr.f32.mxu1 %v593_v54  ;;  %3138 = vmatprep.mubr.f32.mxu0 %v611_v46  ;;  %vm5028_vm14 = vcmp.eq.s32.totalorder %v4103_v51, %v4470_v25  ;;  %vm5029_vm15 = vcmp.eq.s32.totalorder %v4103_v51, %v4472_v35  ;;  %v631_v53 = vand.u32 4294901760, %v4467_v21 }
  0xbb   :  { %5070 = vst [vmem:[#allocation33_spill] sm:$0xff] %v4470_v25  ;;  %5071 = vst [vmem:[#allocation34_spill] sm:$0xff] %v4472_v35  ;;  %v613_v10 = vand.u32 4294901760, %v612_v38  ;;  %v2443_v32 = vsel %vm5028_vm14, 1.0, %v5051_v11  ;;  %v2442_v40 = vsel %vm5029_vm15, 1.0, %v5051_v11  ;;  %v641_v54 = vand.u32 4294901760, %v4465_v39 }
  0xbc   :  { %v4489_v46 = vsub.f32 %v2443_v32, %v2443_v32  ;;  %v4491_v55 = vsub.f32 %v2442_v40, %v2442_v40  ;;  %v632_v38 = vsub.f32 %v4467_v21, %v631_v53  ;;  %v623_v45 = vand.u32 4294901760, %v622_v43 }
  0xbd   :  { %2896 = vmatmul.mubr.f32.gmra.mrb[22].mxu1 %v603_v44  ;;  %3139 = vmatmul.mubr.f32.gmra.mrb[24].mxu0 %v621_v2  ;;  %v4494_v37 = vpop.permute.xlu1 %174  ;;  %v4496_v20 = vpop.permute.xlu0 %171  ;;  %v642_v25 = vsub.f32 %v4465_v39, %v641_v54 }
  0xbe   :  { %5072 = vst [vmem:[#allocation35_spill] sm:$0xff] %v4494_v37  ;;  %2898 = vmatprep.mubr.f32.mxu1 %v613_v10  ;;  %3141 = vmatprep.mubr.f32.mxu0 %v631_v53  ;;  %vm207_vm14 = vcmp.eq.s32.totalorder %v4103_v51, %v4494_v37  ;;  %vm206_vm15 = vcmp.eq.s32.totalorder %v4103_v51, %v4496_v20  ;;  %v633_v32 = vand.u32 4294901760, %v632_v38  ;;  %v651_v44 = vand.u32 4294901760, %v4491_v55 }
  0xbf   :  { %v2445_v2 = vsel %vm207_vm14, 1.0, %v5051_v11  ;;  %v2444_v43 = vsel %vm206_vm15, 1.0, %v5051_v11  ;;  %v661_v10 = vand.u32 4294901760, %v4489_v46  ;;  %v643_v39 = vand.u32 4294901760, %v642_v25 }
  0xc0   :  { %v4513_v53 = vsub.f32 %v2445_v2, %v2445_v2  ;;  %v4515_v40 = vsub.f32 %v2444_v43, %v2444_v43  ;;  %v652_v38 = vsub.f32 %v4491_v55, %v651_v44  ;;  %v3696_v25 = vmov 1.0  }
  0xc1   :  { %2899 = vmatmul.mubr.f32.gmra.mrb[24].mxu1 %v623_v45  ;;  %3142 = vmatmul.mubr.f32.gmra.mrb[26].mxu0 %v641_v54  ;;  %v662_v35 = vsub.f32 %v4489_v46, %v661_v10 }
  0xc2   :  { %2901 = vmatprep.mubr.f32.mxu1 %v633_v32  ;;  %3144 = vmatprep.mubr.f32.mxu0 %v651_v44  ;;  %v653_v21 = vand.u32 4294901760, %v652_v38  ;;  %v671_v37 = vand.u32 4294901760, %v4515_v40  ;;  %v681_v11 = vand.u32 4294901760, %v4513_v53 }
  0xc3   :  { %v663_v45 = vand.u32 4294901760, %v662_v35 }
  0xc4   :  { %v672_v2 = vsub.f32 %v4515_v40, %v671_v37  ;;  %v682_v43 = vsub.f32 %v4513_v53, %v681_v11 }
  0xc5   :  { %2902 = vmatmul.mubr.f32.gmra.mrb[26].mxu1 %v643_v39  ;;  %3145 = vmatmul.mubr.f32.gmra.mrb[28].mxu0 %v661_v10 }
  0xc6   :  { %2904 = vmatprep.mubr.f32.mxu1 %v653_v21  ;;  %3147 = vmatprep.mubr.f32.mxu0 %v671_v37  ;;  %v673_v54 = vand.u32 4294901760, %v672_v2  ;;  %v683_v32 = vand.u32 4294901760, %v682_v43 }
  0xc9   :  { %2905 = vmatmul.mubr.f32.gmra.mrb[28].mxu1 %v663_v45  ;;  %3148 = vmatmul.mubr.f32.gmra.mrb[30].mxu0 %v681_v11 }
  0xca   :  { %2907 = vmatprep.mubr.f32.mxu1 %v673_v54  ;;  %3182 = vmatprep.mubr.msk.f32.mxu0 %vm176_vm1, %v3696_v25 }
  0xcd   :  { %2908 = vmatmul.mubr.f32.gmra.mrb[30].mxu1 %v683_v32  ;;  %3183 = vmatmul.mubr.msk.f32.vlgmr.msra.gmra.mrb[0].mxu0 %vm177_vm3, %v3696_v25 }
  0xce   :  { %2942 = vmatprep.mubr.msk.f32.mxu1 %vm176_vm1, %v3696_v25  ;;  %3185 = vmatprep.mubr.msk.f32.mxu0 %vm178_vm0, %v3696_v25 }
  0xcf   :  { %3473 = vmatpush3.bf16.msra.mxu0 %v3769_v19  ;;  %v5097_v19 = vld [vmem:[#allocation34_spill] sm:$0xff] }
  0xd0   :  { %3475 = vmatprep.subr.bf16.mxu0 %v3777_v22 }
  0xd1   :  { %2943 = vmatmul.mubr.msk.f32.vlgmr.msra.gmra.mrb[0].mxu1 %vm177_vm3, %v3696_v25  ;;  %3186 = vmatmul.mubr.msk.f32.gmra.mrb[2].mxu0 %vm179_vm2, %v3696_v25 }
  0xd2   :  { %3377 = vmatpush3.bf16.msra.mxu1 %v4083_v0  ;;  %2945 = vmatprep.mubr.msk.f32.mxu1 %vm178_vm0, %v3696_v25  ;;  %v5110_v0 = vld [vmem:[#allocation9_spill] sm:$0xff] }
  0xd3   :  { %3188 = vmatprep.mubr.msk.f32.mxu0 %vm180_vm5, %v3696_v25  ;;  %3379 = vmatprep.subr.bf16.mxu1 %v4087_v3 }
  0xd4   :  { %3477 = vmatpush3.bf16.msra.mxu0 %v3777_v22  ;;  %v5100_v22 = vld [vmem:[#allocation33_spill] sm:$0xff] }
  0xd5   :  { %2946 = vmatmul.mubr.msk.f32.gmra.mrb[2].mxu1 %vm179_vm2, %v3696_v25  ;;  %3189 = vmatmul.mubr.msk.f32.gmra.mrb[4].mxu0 %vm181_vm4, %v3696_v25 }
  0xd6   :  { %2948 = vmatprep.mubr.msk.f32.mxu1 %vm180_vm5, %v3696_v25  ;;  %3191 = vmatprep.mubr.msk.f32.mxu0 %vm182_vm7, %v3696_v25 }
  0xd7   :  { %3381 = vmatpush3.bf16.msra.mxu1 %v4087_v3  ;;  %3479 = vmatprep.subr.bf16.mxu0 %v3807_v29  ;;  %v5111_v3 = vld [vmem:[#allocation12_spill] sm:$0xff] }
  0xd8   :  { %3383 = vmatprep.subr.bf16.mxu1 %v4091_v7  ;;  %3481 = vmatpush3.bf16.msra.mxu0 %v3807_v29 }
  0xd9   :  { %2949 = vmatmul.mubr.msk.f32.gmra.mrb[4].mxu1 %vm181_vm4, %v3696_v25  ;;  %3192 = vmatmul.mubr.msk.f32.gmra.mrb[6].mxu0 %vm183_vm6, %v3696_v25 }
  0xda   :  { %2951 = vmatprep.mubr.msk.f32.mxu1 %vm182_vm7, %v3696_v25  ;;  %3194 = vmatprep.mubr.msk.f32.mxu0 %vm184_vm9, %v3696_v25 }
  0xdb   :  { %3385 = vmatpush3.bf16.msra.mxu1 %v4091_v7  ;;  %3483 = vmatprep.subr.bf16.mxu0 %v3835_v36  ;;  %v5112_v7 = vld [vmem:[#allocation11_spill] sm:$0xff] }
  0xdc   :  { %3387 = vmatprep.subr.bf16.mxu1 %v4095_v13  ;;  %3485 = vmatpush3.bf16.msra.mxu0 %v3835_v36  ;;  %v5105_v36 = vld [vmem:[#allocation6_spill] sm:$0xff] }
  0xdd   :  { %2952 = vmatmul.mubr.msk.f32.gmra.mrb[6].mxu1 %vm183_vm6, %v3696_v25  ;;  %3195 = vmatmul.mubr.msk.f32.gmra.mrb[8].mxu0 %vm5040_vm8, %v3696_v25 }
  0xde   :  { %2954 = vmatprep.mubr.msk.f32.mxu1 %vm184_vm9, %v3696_v25  ;;  %3197 = vmatprep.mubr.msk.f32.mxu0 %vm5036_vm11, %v3696_v25 }
  0xdf   :  { %3389 = vmatpush3.bf16.msra.mxu1 %v4095_v13  ;;  %3487 = vmatprep.subr.bf16.mxu0 %v3870_v48  ;;  %v5114_v13 = vld [vmem:[#allocation14_spill] sm:$0xff] }
  0xe0   :  { %3391 = vmatprep.subr.bf16.mxu1 %v4097_v28  ;;  %3489 = vmatpush3.bf16.msra.mxu0 %v3870_v48  ;;  %v5106_v48 = vld [vmem:[#allocation8_spill] sm:$0xff] }
  0xe1   :  { %2955 = vmatmul.mubr.msk.f32.gmra.mrb[8].mxu1 %vm5040_vm8, %v3696_v25  ;;  %3198 = vmatmul.mubr.msk.f32.gmra.mrb[10].mxu0 %vm5038_vm10, %v3696_v25 }
  0xe2   :  { %2957 = vmatprep.mubr.msk.f32.mxu1 %vm5036_vm11, %v3696_v25  ;;  %3200 = vmatprep.mubr.msk.f32.mxu0 %vm5037_vm13, %v3696_v25  ;;  %vm5073_vm11 = vcmp.eq.s32.totalorder %v4103_v51, %v4285_v16 }
  0xe3   :  { %3393 = vmatpush3.bf16.msra.mxu1 %v4097_v28  ;;  %3491 = vmatprep.subr.bf16.mxu0 %v3910_v62  ;;  %v5116_v28 = vld [vmem:[#allocation13_spill] sm:$0xff] }
  0xe4   :  { %3395 = vmatprep.subr.bf16.mxu1 %v4099_v34  ;;  %3493 = vmatpush3.bf16.msra.mxu0 %v3910_v62  ;;  %v5107_v62 = vld [vmem:[#allocation5_spill] sm:$0xff] }
  0xe5   :  { %2958 = vmatmul.mubr.msk.f32.gmra.mrb[10].mxu1 %vm5038_vm10, %v3696_v25  ;;  %3201 = vmatmul.mubr.msk.f32.gmra.mrb[12].mxu0 %vm5039_vm12, %v3696_v25  ;;  %vm5075_vm10 = vcmp.eq.s32.totalorder %v4103_v51, %v4313_v50 }
  0xe6   :  { %2960 = vmatprep.mubr.msk.f32.mxu1 %vm5037_vm13, %v3696_v25  ;;  %3203 = vmatprep.mubr.msk.f32.mxu0 %vm5073_vm11, %v3696_v25  ;;  %vm5074_vm13 = vcmp.eq.s32.totalorder %v4103_v51, %v4283_v57 }
  0xe7   :  { %3397 = vmatpush3.bf16.msra.mxu1 %v4099_v34  ;;  %3495 = vmatprep.subr.bf16.mxu0 %v3954_v12  ;;  %v5118_v34 = vld [vmem:[#allocation16_spill] sm:$0xff] }
  0xe8   :  { %3399 = vmatprep.subr.bf16.mxu1 %v4101_v47  ;;  %3497 = vmatpush3.bf16.msra.mxu0 %v3954_v12  ;;  %v5108_v12 = vld [vmem:[#allocation7_spill] sm:$0xff] }
  0xe9   :  { %2961 = vmatmul.mubr.msk.f32.gmra.mrb[12].mxu1 %vm5039_vm12, %v3696_v25  ;;  %3204 = vmatmul.mubr.msk.f32.gmra.mrb[14].mxu0 %vm5074_vm13, %v3696_v25  ;;  %vm5077_vm12 = vcmp.eq.s32.totalorder %v4103_v51, %v4341_v42 }
  0xea   :  { %2963 = vmatprep.mubr.msk.f32.mxu1 %vm5073_vm11, %v3696_v25  ;;  %3206 = vmatprep.mubr.msk.f32.mxu0 %vm5075_vm10, %v3696_v25  ;;  %vm5076_vm11 = vcmp.eq.s32.totalorder %v4103_v51, %v4311_v49 }
  0xeb   :  { %3401 = vmatpush3.bf16.msra.mxu1 %v4101_v47  ;;  %3499 = vmatprep.subr.bf16.mxu0 %v3977_v27  ;;  %v5120_v47 = vld [vmem:[#allocation15_spill] sm:$0xff] }
  0xec   :  { %3403 = vmatprep.subr.bf16.mxu1 %v4129_v23  ;;  %3501 = vmatpush3.bf16.msra.mxu0 %v3977_v27  ;;  %v5109_v27 = vld [vmem:[#allocation10_spill] sm:$0xff] }
  0xed   :  { %2964 = vmatmul.mubr.msk.f32.gmra.mrb[14].mxu1 %vm5074_vm13, %v3696_v25  ;;  %3207 = vmatmul.mubr.msk.f32.gmra.mrb[16].mxu0 %vm5076_vm11, %v3696_v25  ;;  %vm5078_vm13 = vmmov %vm5076_vm11  ;;  %vm5079_vm11 = vcmp.eq.s32.totalorder %v4103_v51, %v4339_v14 }
  0xee   :  { %2966 = vmatprep.mubr.msk.f32.mxu1 %vm5075_vm10, %v3696_v25  ;;  %3209 = vmatprep.mubr.msk.f32.mxu0 %vm5077_vm12, %v3696_v25  ;;  %vm5080_vm10 = vmmov %vm5077_vm12  ;;  %vm5081_vm12 = vcmp.eq.s32.totalorder %v4103_v51, %v4369_v15 }
  0xef   :  { %3405 = vmatpush3.bf16.msra.mxu1 %v4129_v23  ;;  %vm5082_vm8 = vmmov %vm5079_vm11  ;;  %v5130_v23 = vld [vmem:[#allocation22_spill] sm:$0xff] }
  0xf1   :  { %2967 = vmatmul.mubr.msk.f32.gmra.mrb[16].mxu1 %vm5078_vm13, %v3696_v25  ;;  %3210 = vmatmul.mubr.msk.f32.gmra.mrb[18].mxu0 %vm5079_vm11, %v3696_v25  ;;  %vm5083_vm13 = vcmp.eq.s32.totalorder %v4103_v51, %v4367_v56  ;;  %vm5084_vm11 = vmmov %vm5081_vm12 }
  0xf2   :  { %2969 = vmatprep.mubr.msk.f32.mxu1 %vm5080_vm10, %v3696_v25  ;;  %3212 = vmatprep.mubr.msk.f32.mxu0 %vm5081_vm12, %v3696_v25  ;;  %vm5085_vm10 = vcmp.eq.s32.totalorder %v4103_v51, %v4397_v5  ;;  %vm5086_vm12 = vmmov %vm5083_vm13 }
  0xf5   :  { %2970 = vmatmul.mubr.msk.f32.gmra.mrb[18].mxu1 %vm5082_vm8, %v3696_v25  ;;  %3213 = vmatmul.mubr.msk.f32.gmra.mrb[20].mxu0 %vm5083_vm13, %v3696_v25  ;;  %vm5087_vm8 = vcmp.eq.s32.totalorder %v4103_v51, %v4395_v18  ;;  %vm5088_vm13 = vmmov %vm5085_vm10 }
  0xf6   :  { %2972 = vmatprep.mubr.msk.f32.mxu1 %vm5084_vm11, %v3696_v25  ;;  %3215 = vmatprep.mubr.msk.f32.mxu0 %vm5085_vm10, %v3696_v25  ;;  %vm5089_vm11 = vcmp.eq.s32.totalorder %v4103_v51, %v4424_v26  ;;  %vm5090_vm10 = vmmov %vm5087_vm8 }
  0xf9   :  { %2973 = vmatmul.mubr.msk.f32.gmra.mrb[20].mxu1 %vm5086_vm12, %v3696_v25  ;;  %3216 = vmatmul.mubr.msk.f32.gmra.mrb[22].mxu0 %vm5087_vm8, %v3696_v25  ;;  %vm5091_vm12 = vcmp.eq.s32.totalorder %v4103_v51, %v4422_v58  ;;  %vm5092_vm8 = vmmov %vm5089_vm11 }
  0xfa   :  { %2975 = vmatprep.mubr.msk.f32.mxu1 %vm5088_vm13, %v3696_v25  ;;  %3218 = vmatprep.mubr.msk.f32.mxu0 %vm5089_vm11, %v3696_v25  ;;  %vm5093_vm13 = vcmp.eq.s32.totalorder %v4103_v51, %v4448_v63  ;;  %vm5094_vm11 = vmmov %vm5091_vm12 }
  0xfd   :  { %2976 = vmatmul.mubr.msk.f32.gmra.mrb[22].mxu1 %vm5090_vm10, %v3696_v25  ;;  %3219 = vmatmul.mubr.msk.f32.gmra.mrb[24].mxu0 %vm5091_vm12, %v3696_v25  ;;  %vm5095_vm10 = vcmp.eq.s32.totalorder %v4103_v51, %v4446_v4  ;;  %vm5096_vm12 = vmmov %vm5093_vm13 }
  0xfe   :  { %2978 = vmatprep.mubr.msk.f32.mxu1 %vm5092_vm8, %v3696_v25  ;;  %3221 = vmatprep.mubr.msk.f32.mxu0 %vm5093_vm13, %v3696_v25  ;;  %vm5098_vm8 = vcmp.eq.s32.totalorder %v4103_v51, %v5097_v19  ;;  %vm5099_vm13 = vmmov %vm5095_vm10 }
 0x101   :  { %2979 = vmatmul.mubr.msk.f32.gmra.mrb[24].mxu1 %vm5094_vm11, %v3696_v25  ;;  %3222 = vmatmul.mubr.msk.f32.gmra.mrb[26].mxu0 %vm5095_vm10, %v3696_v25  ;;  %vm5101_vm11 = vcmp.eq.s32.totalorder %v4103_v51, %v5100_v22  ;;  %vm5102_vm10 = vmmov %vm5098_vm8 }
 0x102   :  { %2981 = vmatprep.mubr.msk.f32.mxu1 %vm5096_vm12, %v3696_v25  ;;  %3224 = vmatprep.mubr.msk.f32.mxu0 %vm5098_vm8, %v3696_v25  ;;  %vm5103_vm12 = vmmov %vm5101_vm11  ;;  %vm5131_vm8 = vcmp.eq.s32.totalorder %v4103_v51, %v4341_v42 }
 0x105   :  { %2982 = vmatmul.mubr.msk.f32.gmra.mrb[26].mxu1 %vm5099_vm13, %v3696_v25  ;;  %3225 = vmatmul.mubr.msk.f32.gmra.mrb[28].mxu0 %vm5101_vm11, %v3696_v25  ;;  %vm5133_vm13 = vcmp.eq.s32.totalorder %v4103_v51, %v4339_v14  ;;  %vm5135_vm11 = vcmp.eq.s32.totalorder %v4103_v51, %v4369_v15 }
 0x106   :  { %2984 = vmatprep.mubr.msk.f32.mxu1 %vm5102_vm10, %v3696_v25  ;;  %3227 = vmatprep.mubr.msk.f32.mxu0 %vm206_vm15, %v3696_v25  ;;  %vm5137_vm10 = vcmp.eq.s32.totalorder %v4103_v51, %v4367_v56 }
 0x109   :  { %2985 = vmatmul.mubr.msk.f32.gmra.mrb[28].mxu1 %vm5103_vm12, %v3696_v25  ;;  %3228 = vmatmul.mubr.msk.f32.gmra.mrb[30].mxu0 %vm207_vm14, %v3696_v25  ;;  %vm5139_vm12 = vcmp.eq.s32.totalorder %v4103_v51, %v4397_v5 }
 0x10a   :  { %2987 = vmatprep.mubr.msk.f32.mxu1 %vm206_vm15, %v3696_v25  ;;  %3262 = vmatprep.mubr.msk.f32.mxu0 %vm176_vm1, %v3696_v25  ;;  %vm5115_vm1 = vcmp.eq.s32.totalorder %v4103_v51, %v4229_v24  ;;  %v5148_v24 = vld [vmem:[#allocation29_spill] sm:$0xff] }
 0x10d   :  { %2988 = vmatmul.mubr.msk.f32.gmra.mrb[30].mxu1 %vm207_vm14, %v3696_v25  ;;  %3263 = vmatmul.mubr.msk.f32.vlgmr.msra.gmra.mrb[0].mxu0 %vm177_vm3, %v3696_v25  ;;  %vm5119_vm3 = vcmp.eq.s32.totalorder %v4103_v51, %v4257_v30  ;;  %v5140_v30 = vld [vmem:[#allocation25_spill] sm:$0xff] }
 0x10e   :  { %3022 = vmatprep.mubr.f32.mxu1 %v5105_v36  ;;  %3265 = vmatprep.mubr.msk.f32.mxu0 %vm178_vm0, %v3696_v25  ;;  %vm5113_vm0 = vcmp.eq.s32.totalorder %v4103_v51, %v4201_v61  ;;  %v5142_v61 = vld [vmem:[#allocation28_spill] sm:$0xff] }
 0x111   :  { %3023 = vmatmul.mubr.f32.vlgmr.msra.gmra.mrb[0].mxu1 %v5106_v48  ;;  %3266 = vmatmul.mubr.msk.f32.gmra.mrb[2].mxu0 %vm179_vm2, %v3696_v25  ;;  %vm5117_vm2 = vcmp.eq.s32.totalorder %v4103_v51, %v4227_v31  ;;  %v5146_v31 = vld [vmem:[#allocation30_spill] sm:$0xff] }
 0x112   :  { %3025 = vmatprep.mubr.f32.mxu1 %v5107_v62  ;;  %3268 = vmatprep.mubr.msk.f32.mxu0 %vm180_vm5, %v3696_v25  ;;  %vm5123_vm5 = vcmp.eq.s32.totalorder %v4103_v51, %v4285_v16 }
 0x115   :  { %3026 = vmatmul.mubr.f32.gmra.mrb[2].mxu1 %v5108_v12  ;;  %3269 = vmatmul.mubr.msk.f32.gmra.mrb[4].mxu0 %vm181_vm4, %v3696_v25  ;;  %vm5121_vm4 = vcmp.eq.s32.totalorder %v4103_v51, %v4255_v6  ;;  %v5150_v6 = vld [vmem:[#allocation32_spill] sm:$0xff] }
 0x116   :  { %3028 = vmatprep.mubr.f32.mxu1 %v5109_v27  ;;  %3271 = vmatprep.mubr.msk.f32.mxu0 %vm182_vm7, %v3696_v25  ;;  %vm5127_vm7 = vcmp.eq.s32.totalorder %v4103_v51, %v4313_v50 }
 0x119   :  { %3029 = vmatmul.mubr.f32.gmra.mrb[4].mxu1 %v5110_v0  ;;  %3272 = vmatmul.mubr.msk.f32.gmra.mrb[6].mxu0 %vm183_vm6, %v3696_v25  ;;  %vm5125_vm6 = vcmp.eq.s32.totalorder %v4103_v51, %v4283_v57  ;;  %v5152_v57 = vld [vmem:[#allocation31_spill] sm:$0xff] }
 0x11a   :  { %3031 = vmatprep.mubr.f32.mxu1 %v5111_v3  ;;  %3274 = vmatprep.mubr.msk.f32.mxu0 %vm184_vm9, %v3696_v25  ;;  %vm5129_vm9 = vcmp.eq.s32.totalorder %v4103_v51, %v4311_v49 }
 0x11d   :  { %3032 = vmatmul.mubr.f32.gmra.mrb[6].mxu1 %v5112_v7  ;;  %3275 = vmatmul.mubr.msk.f32.gmra.mrb[8].mxu0 %vm5113_vm0, %v3696_v25  ;;  %vm5141_vm0 = vcmp.eq.s32.totalorder %v4103_v51, %v4395_v18 }
 0x11e   :  { %3034 = vmatprep.mubr.f32.mxu1 %v5114_v13  ;;  %3277 = vmatprep.mubr.msk.f32.mxu0 %vm5115_vm1, %v3696_v25  ;;  %vm5143_vm1 = vcmp.eq.s32.totalorder %v4103_v51, %v4424_v26 }
 0x121   :  { %3035 = vmatmul.mubr.f32.gmra.mrb[8].mxu1 %v5116_v28  ;;  %3278 = vmatmul.mubr.msk.f32.gmra.mrb[10].mxu0 %vm5117_vm2, %v3696_v25  ;;  %vm5145_vm2 = vcmp.eq.s32.totalorder %v4103_v51, %v4422_v58 }
 0x122   :  { %3037 = vmatprep.mubr.f32.mxu1 %v5118_v34  ;;  %3280 = vmatprep.mubr.msk.f32.mxu0 %vm5119_vm3, %v3696_v25  ;;  %vm5147_vm3 = vcmp.eq.s32.totalorder %v4103_v51, %v4448_v63 }
 0x125   :  { %3038 = vmatmul.mubr.f32.gmra.mrb[10].mxu1 %v5120_v47  ;;  %3281 = vmatmul.mubr.msk.f32.gmra.mrb[12].mxu0 %vm5121_vm4, %v3696_v25  ;;  %vm5149_vm4 = vcmp.eq.s32.totalorder %v4103_v51, %v4446_v4 }
 0x126   :  { %3040 = vmatprep.mubr.f32.mxu1 %v5122_v52  ;;  %3283 = vmatprep.mubr.msk.f32.mxu0 %vm5123_vm5, %v3696_v25  ;;  %vm5151_vm5 = vcmp.eq.s32.totalorder %v4103_v51, %v5097_v19 }
 0x129   :  { %3041 = vmatmul.mubr.f32.gmra.mrb[12].mxu1 %v5124_v41  ;;  %3284 = vmatmul.mubr.msk.f32.gmra.mrb[14].mxu0 %vm5125_vm6, %v3696_v25  ;;  %vm5153_vm6 = vcmp.eq.s32.totalorder %v4103_v51, %v5100_v22 }
 0x12a   :  { %3043 = vmatprep.mubr.f32.mxu1 %v5126_v8  ;;  %3286 = vmatprep.mubr.msk.f32.mxu0 %vm5127_vm7, %v3696_v25 }
 0x12d   :  { %3044 = vmatmul.mubr.f32.gmra.mrb[14].mxu1 %v5128_v9  ;;  %3287 = vmatmul.mubr.msk.f32.gmra.mrb[16].mxu0 %vm5129_vm9, %v3696_v25 }
 0x12e   :  { %3046 = vmatprep.mubr.f32.mxu1 %v5130_v23  ;;  %3289 = vmatprep.mubr.msk.f32.mxu0 %vm5131_vm8, %v3696_v25 }
 0x131   :  { %3047 = vmatmul.mubr.f32.gmra.mrb[16].mxu1 %v5132_v59  ;;  %3290 = vmatmul.mubr.msk.f32.gmra.mrb[18].mxu0 %vm5133_vm13, %v3696_v25 }
 0x132   :  { %3049 = vmatprep.mubr.f32.mxu1 %v5134_v60  ;;  %3292 = vmatprep.mubr.msk.f32.mxu0 %vm5135_vm11, %v3696_v25 }
 0x135   :  { %3050 = vmatmul.mubr.f32.gmra.mrb[18].mxu1 %v5136_v17  ;;  %3293 = vmatmul.mubr.msk.f32.gmra.mrb[20].mxu0 %vm5137_vm10, %v3696_v25 }
 0x136   :  { %3052 = vmatprep.mubr.f32.mxu1 %v5138_v33  ;;  %3295 = vmatprep.mubr.msk.f32.mxu0 %vm5139_vm12, %v3696_v25 }
 0x139   :  { %3053 = vmatmul.mubr.f32.gmra.mrb[20].mxu1 %v5140_v30  ;;  %3296 = vmatmul.mubr.msk.f32.gmra.mrb[22].mxu0 %vm5141_vm0, %v3696_v25 }
 0x13a   :  { %3055 = vmatprep.mubr.f32.mxu1 %v5142_v61  ;;  %3298 = vmatprep.mubr.msk.f32.mxu0 %vm5143_vm1, %v3696_v25 }
 0x13d   :  { %3056 = vmatmul.mubr.f32.gmra.mrb[22].mxu1 %v5144_v1  ;;  %3299 = vmatmul.mubr.msk.f32.gmra.mrb[24].mxu0 %vm5145_vm2, %v3696_v25 }
 0x13e   :  { %3058 = vmatprep.mubr.f32.mxu1 %v5146_v31  ;;  %3301 = vmatprep.mubr.msk.f32.mxu0 %vm5147_vm3, %v3696_v25 }
 0x141   :  { %3059 = vmatmul.mubr.f32.gmra.mrb[24].mxu1 %v5148_v24  ;;  %3302 = vmatmul.mubr.msk.f32.gmra.mrb[26].mxu0 %vm5149_vm4, %v3696_v25 }
 0x142   :  { %3061 = vmatprep.mubr.f32.mxu1 %v5150_v6  ;;  %3304 = vmatprep.mubr.msk.f32.mxu0 %vm5151_vm5, %v3696_v25 }
 0x145   :  { %3062 = vmatmul.mubr.f32.gmra.mrb[26].mxu1 %v5152_v57  ;;  %3305 = vmatmul.mubr.msk.f32.gmra.mrb[28].mxu0 %vm5153_vm6, %v3696_v25 }
 0x146   :  { %3064 = vmatprep.mubr.f32.mxu1 %v4491_v55  ;;  %3307 = vmatprep.mubr.msk.f32.mxu0 %vm206_vm15, %v3696_v25 }
 0x149   :  { %3065 = vmatmul.mubr.f32.gmra.mrb[28].mxu1 %v4489_v46  ;;  %3308 = vmatmul.mubr.msk.f32.gmra.mrb[30].mxu0 %vm207_vm14, %v3696_v25 }
 0x14a   :  { %3067 = vmatprep.mubr.f32.mxu1 %v4515_v40 }
 0x14d   :  { %3068 = vmatmul.mubr.f32.gmra.mrb[30].mxu1 %v4513_v53 }
 0x1e0   :  { %v3264_v16 = vpop.f32.mrb[0].mxu0 }
 0x1e1   :  { %v2072_v49 = vpop.f32.mrb[1].mxu0 }
 0x1e4   :  { %v3024_v50 = vpop.f32.mrb[0].mxu1  ;;  %v3267_v14 = vpop.f32.mrb[2].mxu0 }
 0x1e5   :  { %v3502_v42 = vadd.f32 %v3264_v16, %v3024_v50  ;;  %v1126_v56 = vpop.f32.mrb[1].mxu1  ;;  %v2084_v15 = vpop.f32.mrb[3].mxu0 }
 0x1e6   :  { %v3503_v4 = vadd.f32 %v2072_v49, %v1126_v56 }
 0x1e7   :  { %2267 = vst [vmem:[#allocation2 + $0x8] sm:$0xff] %v3502_v42 }
 0x1e8   :  { %2266 = vst [vmem:[#allocation2] sm:$0xff] %v3503_v4  ;;  %v3027_v63 = vpop.f32.mrb[2].mxu1  ;;  %v3270_v18 = vpop.f32.mrb[4].mxu0 }
 0x1e9   :  { %v3504_v5 = vadd.f32 %v3267_v14, %v3027_v63  ;;  %v1140_v35 = vpop.f32.mrb[3].mxu1  ;;  %v2096_v51 = vpop.f32.mrb[5].mxu0 }
 0x1ea   :  { %v3505_v58 = vadd.f32 %v2084_v15, %v1140_v35 }
 0x1eb   :  { %2269 = vst [vmem:[#allocation2 + $0x18] sm:$0xff] %v3504_v5 }
 0x1ec   :  { %2268 = vst [vmem:[#allocation2 + $0x10] sm:$0xff] %v3505_v58  ;;  %v3030_v26 = vpop.f32.mrb[4].mxu1  ;;  %v3273_v37 = vpop.f32.mrb[6].mxu0 }
 0x1ed   :  { %v3506_v20 = vadd.f32 %v3270_v18, %v3030_v26  ;;  %v1154_v39 = vpop.f32.mrb[5].mxu1  ;;  %v2108_v21 = vpop.f32.mrb[7].mxu0 }
 0x1ee   :  { %v3507_v46 = vadd.f32 %v2096_v51, %v1154_v39 }
 0x1ef   :  { %2271 = vst [vmem:[#allocation2 + $0x28] sm:$0xff] %v3506_v20 }
 0x1f0   :  { %2270 = vst [vmem:[#allocation2 + $0x20] sm:$0xff] %v3507_v46  ;;  %v3033_v55 = vpop.f32.mrb[6].mxu1  ;;  %v3276_v44 = vpop.f32.mrb[8].mxu0 }
 0x1f1   :  { %v3508_v10 = vadd.f32 %v3273_v37, %v3033_v55  ;;  %v1168_v53 = vpop.f32.mrb[7].mxu1  ;;  %v2120_v40 = vpop.f32.mrb[9].mxu0 }
 0x1f2   :  { %v3509_v38 = vadd.f32 %v2108_v21, %v1168_v53 }
 0x1f3   :  { %2273 = vst [vmem:[#allocation2 + $0x38] sm:$0xff] %v3508_v10 }
 0x1f4   :  { %2272 = vst [vmem:[#allocation2 + $0x30] sm:$0xff] %v3509_v38  ;;  %v3036_v11 = vpop.f32.mrb[8].mxu1  ;;  %v3279_v2 = vpop.f32.mrb[10].mxu0 }
 0x1f5   :  { %v3510_v45 = vadd.f32 %v3276_v44, %v3036_v11  ;;  %v1182_v54 = vpop.f32.mrb[9].mxu1  ;;  %v2132_v43 = vpop.f32.mrb[11].mxu0 }
 0x1f6   :  { %v3511_v25 = vadd.f32 %v2120_v40, %v1182_v54 }
 0x1f7   :  { %2275 = vst [vmem:[#allocation2 + $0x48] sm:$0xff] %v3510_v45 }
 0x1f8   :  { %2274 = vst [vmem:[#allocation2 + $0x40] sm:$0xff] %v3511_v25  ;;  %v3039_v32 = vpop.f32.mrb[10].mxu1  ;;  %v3282_v19 = vpop.f32.mrb[12].mxu0 }
 0x1f9   :  { %v3512_v22 = vadd.f32 %v3279_v2, %v3039_v32  ;;  %v1196_v29 = vpop.f32.mrb[11].mxu1  ;;  %v2144_v36 = vpop.f32.mrb[13].mxu0 }
 0x1fa   :  { %v3513_v48 = vadd.f32 %v2132_v43, %v1196_v29 }
 0x1fb   :  { %2277 = vst [vmem:[#allocation2 + $0x58] sm:$0xff] %v3512_v22 }
 0x1fc   :  { %2276 = vst [vmem:[#allocation2 + $0x50] sm:$0xff] %v3513_v48  ;;  %v3042_v62 = vpop.f32.mrb[12].mxu1  ;;  %v3285_v12 = vpop.f32.mrb[14].mxu0 }
 0x1fd   :  { %v3514_v27 = vadd.f32 %v3282_v19, %v3042_v62  ;;  %v1210_v0 = vpop.f32.mrb[13].mxu1  ;;  %v2156_v3 = vpop.f32.mrb[15].mxu0 }
 0x1fe   :  { %v3515_v7 = vadd.f32 %v2144_v36, %v1210_v0 }
 0x1ff   :  { %2279 = vst [vmem:[#allocation2 + $0x68] sm:$0xff] %v3514_v27 }
 0x200   :  { %2278 = vst [vmem:[#allocation2 + $0x60] sm:$0xff] %v3515_v7  ;;  %v3045_v13 = vpop.f32.mrb[14].mxu1  ;;  %v3288_v28 = vpop.f32.mrb[16].mxu0 }
 0x201   :  { %v3516_v34 = vadd.f32 %v3285_v12, %v3045_v13  ;;  %v1224_v47 = vpop.f32.mrb[15].mxu1  ;;  %v2168_v52 = vpop.f32.mrb[17].mxu0 }
 0x202   :  { %v3517_v41 = vadd.f32 %v2156_v3, %v1224_v47 }
 0x203   :  { %2281 = vst [vmem:[#allocation2 + $0x78] sm:$0xff] %v3516_v34 }
 0x204   :  { %2280 = vst [vmem:[#allocation2 + $0x70] sm:$0xff] %v3517_v41  ;;  %v3048_v8 = vpop.f32.mrb[16].mxu1  ;;  %v3291_v9 = vpop.f32.mrb[18].mxu0 }
 0x205   :  { %v3518_v23 = vadd.f32 %v3288_v28, %v3048_v8  ;;  %v1238_v59 = vpop.f32.mrb[17].mxu1  ;;  %v2180_v60 = vpop.f32.mrb[19].mxu0 }
 0x206   :  { %v3519_v17 = vadd.f32 %v2168_v52, %v1238_v59 }
 0x207   :  { %2283 = vst [vmem:[#allocation2 + $0x88] sm:$0xff] %v3518_v23 }
 0x208   :  { %2282 = vst [vmem:[#allocation2 + $0x80] sm:$0xff] %v3519_v17  ;;  %v3051_v33 = vpop.f32.mrb[18].mxu1  ;;  %v3294_v30 = vpop.f32.mrb[20].mxu0 }
 0x209   :  { %v3520_v61 = vadd.f32 %v3291_v9, %v3051_v33  ;;  %v1252_v1 = vpop.f32.mrb[19].mxu1  ;;  %v2192_v31 = vpop.f32.mrb[21].mxu0 }
 0x20a   :  { %v3521_v24 = vadd.f32 %v2180_v60, %v1252_v1 }
 0x20b   :  { %2285 = vst [vmem:[#allocation2 + $0x98] sm:$0xff] %v3520_v61 }
 0x20c   :  { %2284 = vst [vmem:[#allocation2 + $0x90] sm:$0xff] %v3521_v24  ;;  %v3054_v6 = vpop.f32.mrb[20].mxu1  ;;  %v3297_v57 = vpop.f32.mrb[22].mxu0 }
 0x20d   :  { %v3522_v16 = vadd.f32 %v3294_v30, %v3054_v6  ;;  %v1266_v49 = vpop.f32.mrb[21].mxu1  ;;  %v2204_v50 = vpop.f32.mrb[23].mxu0 }
 0x20e   :  { %v3523_v14 = vadd.f32 %v2192_v31, %v1266_v49 }
 0x20f   :  { %2287 = vst [vmem:[#allocation2 + $0xa8] sm:$0xff] %v3522_v16 }
 0x210   :  { %2286 = vst [vmem:[#allocation2 + $0xa0] sm:$0xff] %v3523_v14  ;;  %v3057_v42 = vpop.f32.mrb[22].mxu1  ;;  %v3300_v56 = vpop.f32.mrb[24].mxu0 }
 0x211   :  { %v3524_v15 = vadd.f32 %v3297_v57, %v3057_v42  ;;  %v1280_v4 = vpop.f32.mrb[23].mxu1  ;;  %v2216_v63 = vpop.f32.mrb[25].mxu0 }
 0x212   :  { %v3525_v18 = vadd.f32 %v2204_v50, %v1280_v4 }
 0x213   :  { %2289 = vst [vmem:[#allocation2 + $0xb8] sm:$0xff] %v3524_v15 }
 0x214   :  { %2288 = vst [vmem:[#allocation2 + $0xb0] sm:$0xff] %v3525_v18  ;;  %v3060_v5 = vpop.f32.mrb[24].mxu1  ;;  %v3303_v35 = vpop.f32.mrb[26].mxu0 }
 0x215   :  { %v3526_v51 = vadd.f32 %v3300_v56, %v3060_v5  ;;  %v1294_v58 = vpop.f32.mrb[25].mxu1  ;;  %v2228_v26 = vpop.f32.mrb[27].mxu0 }
 0x216   :  { %v3527_v37 = vadd.f32 %v2216_v63, %v1294_v58 }
 0x217   :  { %2291 = vst [vmem:[#allocation2 + $0xc8] sm:$0xff] %v3526_v51 }
 0x218   :  { %2290 = vst [vmem:[#allocation2 + $0xc0] sm:$0xff] %v3527_v37  ;;  %v3063_v20 = vpop.f32.mrb[26].mxu1  ;;  %v3306_v39 = vpop.f32.mrb[28].mxu0 }
 0x219   :  { %v3528_v21 = vadd.f32 %v3303_v35, %v3063_v20  ;;  %v1308_v46 = vpop.f32.mrb[27].mxu1  ;;  %v2240_v55 = vpop.f32.mrb[29].mxu0 }
 0x21a   :  { %v3529_v44 = vadd.f32 %v2228_v26, %v1308_v46 }
 0x21b   :  { %2293 = vst [vmem:[#allocation2 + $0xd8] sm:$0xff] %v3528_v21 }
 0x21c   :  { %2292 = vst [vmem:[#allocation2 + $0xd0] sm:$0xff] %v3529_v44  ;;  %v3066_v10 = vpop.f32.mrb[28].mxu1  ;;  %v3309_v53 = vpop.f32.mrb[30].mxu0 }
 0x21d   :  { %v3530_v40 = vadd.f32 %v3306_v39, %v3066_v10  ;;  %v1322_v38 = vpop.f32.mrb[29].mxu1  ;;  %v2252_v11 = vpop.f32.mrb[31].mxu0 }
 0x21e   :  { %v3531_v2 = vadd.f32 %v2240_v55, %v1322_v38 }
 0x21f   :  { %2295 = vst [vmem:[#allocation2 + $0xe8] sm:$0xff] %v3530_v40 }
 0x220   :  { %2294 = vst [vmem:[#allocation2 + $0xe0] sm:$0xff] %v3531_v2  ;;  %v3069_v45 = vpop.f32.mrb[30].mxu1 }
 0x221   :  { %v3532_v54 = vadd.f32 %v3309_v53, %v3069_v45  ;;  %v1336_v43 = vpop.f32.mrb[31].mxu1 }
 0x222   :  { %v3533_v25 = vadd.f32 %v2252_v11, %v1336_v43 }
 0x223   :  { %2297 = vst [vmem:[#allocation2 + $0xf8] sm:$0xff] %v3532_v54 }
 0x224   :  { %2296 = vst [vmem:[#allocation2 + $0xf0] sm:$0xff] %v3533_v25 }
 0x225   :  { %3681 = shalt.err (!%p3678_p4)
}
 0x226   :  { %s3682_s23 = scalar_lea.hbm %s4983_s2, 4096 }
 0x227   :  { %p3683_p5 = scmp.ne.s32.totalorder %s4983_s2, %s3682_s23  ;;  %p3686_p6 = scmp.lt.u32.totalorder %s3682_s23, %s4983_s2 }
 0x229   :  { %p3688_p7 = pnand %p3686_p6, %p3683_p5 }
 0x22b   :  { %3691 = shalt.err (!%p3688_p7)
}
 0x22c   :  { %s3698_s28 = smov 128   ;;  %s3699_s29 = smov 8  }
 0x22d   :  { %2409 = dma.vmem_to_hbm [thread:$0]  %s2404_s20, 4096, %s4983_s2, [#allocation3], %s3698_s28, %s3698_s28, %s3699_s29  }
 0x22e   :  { %3692 = dma.done.wait [#allocation3], 4096  }
 0x22f   :  { %3693 = vsyncadd [#allocation3], 4294963200 }
 0x230   :  { %2413 = vsyncpa [#allocation3], 1 }

</bundles_post_ra>
